<compile_context>
chip_gen: v5e
topology: v5e:2x2
jax: 0.10.0
libtpu: 0.0.40
codegen_flags: <defaults>
</compile_context>

<pallas_src>
import jax
import jax.numpy as jnp
from jax.experimental import pallas as pl
from jax.experimental.pallas import tpu as pltpu

# dot_general dims contracting the last axis of both operands ("a @ b.T").
_TRANS_B = (((1,), (1,)), ((), ()))


def make_value_critic_kernel(num_layers: int, eps: float = 1e-5):
    """Fused forward: num_layers x (Linear + LayerNorm + ReLU) + final Linear."""

    def kernel(*refs):
        x_ref = refs[0]
        w_refs = refs[1:1 + num_layers]
        vec_ref = refs[1 + num_layers]   # (3*L + 2, H) packed vectors
        o_ref = refs[-1]                  # (1, tile_b)

        h = x_ref[...]
        for i in range(num_layers):
            w = w_refs[i][...]
            if h.dtype != w.dtype:        # keep native (e.g. bf16) MXU operands
                h = h.astype(w.dtype)
            h = jnp.dot(h, w, preferred_element_type=jnp.float32)  # f32 acc

            b = vec_ref[3 * i:3 * i + 1, :].astype(jnp.float32)
            g = vec_ref[3 * i + 1:3 * i + 2, :].astype(jnp.float32)
            beta = vec_ref[3 * i + 2:3 * i + 3, :].astype(jnp.float32)
            h = h + b

            # Two-pass LayerNorm in f32 (numerically safe; biased variance).
            mu = jnp.mean(h, axis=-1, keepdims=True)
            c = h - mu
            var = jnp.mean(c * c, axis=-1, keepdims=True)
            h = c * jax.lax.rsqrt(var + eps)
            h = h * g + beta
            h = jnp.maximum(h, 0.0)       # ReLU

        wf = vec_ref[3 * num_layers:3 * num_layers + 1, :]         # (1, H)
        bf = vec_ref[3 * num_layers + 1:3 * num_layers + 2, 0:1]   # (1, 1)
        hv = h.astype(wf.dtype) if h.dtype != wf.dtype else h
        # (1, H) x (tile_b, H)^T -> (1, tile_b): single lane-dense output row.
        out = jax.lax.dot_general(wf, hv, dimension_numbers=_TRANS_B,
                                  preferred_element_type=jnp.float32)
        out = out + bf.astype(jnp.float32)
        o_ref[...] = out.astype(o_ref.dtype)

    return kernel


def init_value_critic_params(key, state_dim, num_layers, hidden_dim, dtype=jnp.float32):
    """Deterministic synthetic parameter init (shapes match the PyTorch module)."""
    params = {"w": [], "b": [], "g": [], "beta": []}
    in_dim = state_dim
    for _ in range(num_layers):
        key, kw = jax.random.split(key)
        scale = 1.0 / jnp.sqrt(jnp.float32(in_dim))
        params["w"].append(
            (jax.random.uniform(kw, (in_dim, hidden_dim), jnp.float32, -1.0, 1.0) * scale).astype(dtype))
        params["b"].append(jnp.zeros((hidden_dim,), dtype))
        params["g"].append(jnp.ones((hidden_dim,), dtype))      # LayerNorm weight
        params["beta"].append(jnp.zeros((hidden_dim,), dtype))  # LayerNorm bias
        in_dim = hidden_dim
    key, kf = jax.random.split(key)
    scale = 1.0 / jnp.sqrt(jnp.float32(hidden_dim))
    params["wf"] = (jax.random.uniform(kf, (hidden_dim, 1), jnp.float32, -1.0, 1.0) * scale).astype(dtype)
    params["bf"] = jnp.zeros((1,), dtype)
    return params


def pack_value_critic_params(params):
    """Pack all non-matmul parameters into one (3*L + 2, H) slab, done ONCE."""
    num_layers = len(params["w"])
    H = params["w"][0].shape[1]
    dtype = params["w"][0].dtype
    rows = []
    for i in range(num_layers):
        rows += [params["b"][i], params["g"][i], params["beta"][i]]
    rows.append(jnp.reshape(params["wf"], (H,)))                       # final weights
    rows.append(jnp.zeros((H,), dtype).at[0].set(params["bf"][0]))     # final bias (elem 0)
    vec = jnp.stack(rows, axis=0).astype(dtype)
    return {"w": tuple(params["w"]), "vec": vec, "num_layers": num_layers}


def _round_up(x, m):
    return ((x + m - 1) // m) * m


def value_critic_forward(x, packed, *, tile_b=512):
    num_layers = packed["num_layers"]
    weights = packed["w"]
    vec = packed["vec"]
    B, S = x.shape
    H = weights[0].shape[1]

    itemsize = jnp.dtype(x.dtype).itemsize
    # Sublane packing of the activation dtype: 8 rows f32, 16 bf16, 32 int8/fp8.
    row_align = 8 if itemsize >= 4 else (16 if itemsize == 2 else 32)
    if B <= tile_b:
        tile_b = _round_up(B, row_align)
    else:
        # Must be a 128-multiple; the default (512) is a 256-multiple for the
        # v6e/v7x MXU.  B > tile_b here guarantees >= 2 grid steps, so the
        # "parallel" axis can be split across v7x's two TensorCores.
        tile_b = max(128, _round_up(tile_b, 128))
    B_pad = _round_up(B, tile_b)
    num_tiles = B_pad // tile_b
    x_in = x if B_pad == B else jnp.pad(x, ((0, B_pad - B), (0, 0)))

    param_bytes = sum(int(a.size) * jnp.dtype(a.dtype).itemsize for a in (*weights, vec))
    x_tile_bytes = tile_b * S * itemsize
    out_tile_bytes = tile_b * itemsize
    act_bytes = 4 * tile_b * H * 4   # rough f32 activation working set

    def vmem_cap():
        try:
            return int(0.75 * pltpu.get_tpu_info().vmem_capacity_bytes)
        except Exception:
            return 48 << 20          # conservative: fits v7x's 64 MiB/TC

    def run(single_buffer_params):
        def const_spec(shape):
            idx = lambda i, _n=len(shape): (0,) * _n
            if single_buffer_params:
                # Grid-invariant operand: single buffer is enough.
                return pl.BlockSpec(shape, idx, pipeline_mode=pl.Buffered(1))
            return pl.BlockSpec(shape, idx)

        in_specs = [pl.BlockSpec((tile_b, S), lambda i: (i, 0))]   # x: tiled over batch
        in_specs += [const_spec(w.shape) for w in weights]
        in_specs += [const_spec(vec.shape)]

        buf = 1 if single_buffer_params else 2
        need = (buf * param_bytes + 2 * (x_tile_bytes + out_tile_bytes)
                + act_bytes + (4 << 20))
        vmem_limit = int(max(16 << 20, min(vmem_cap(), need)))

        return pl.pallas_call(
            make_value_critic_kernel(num_layers),
            out_shape=jax.ShapeDtypeStruct((1, B_pad), x.dtype),
            grid=(num_tiles,),
            in_specs=in_specs,
            out_specs=pl.BlockSpec((1, tile_b), lambda i: (0, i)),
            compiler_params=pltpu.CompilerParams(
                dimension_semantics=("parallel",),
                vmem_limit_bytes=vmem_limit),
        )(x_in, *weights, vec)

    try:
        out = run(True)
    except Exception:
        # Fallback if single-buffered (pl.Buffered(1)) params are unsupported.
        out = run(False)

    return out[0, :B].reshape(B, 1)


def value_critic_reference(x, params, num_layers, eps=1e-5):
    """Plain-JAX reference for correctness check."""
    h = x.astype(jnp.float32)
    for i in range(num_layers):
        h = h @ params["w"][i] + params["b"][i]
        mu = jnp.mean(h, axis=-1, keepdims=True)
        var = jnp.mean((h - mu) ** 2, axis=-1, keepdims=True)
        h = (h - mu) / jnp.sqrt(var + eps)
        h = h * params["g"][i] + params["beta"][i]
        h = jnp.maximum(h, 0.0)
    return h @ params["wf"] + params["bf"]


if __name__ == "__main__":
    # Small shapes consistent with the module: (batch, state_dim) -> (batch, 1)
    B, STATE_DIM, HIDDEN, NUM_LAYERS = 16, 32, 128, 3

    key = jax.random.PRNGKey(0)
    kx, kp, kx2 = jax.random.split(key, 3)

    params = init_value_critic_params(kp, STATE_DIM, NUM_LAYERS, HIDDEN)
    packed = pack_value_critic_params(params)   # packed once, reused per call

    # f32, single batch tile
    x = jax.random.normal(kx, (B, STATE_DIM), jnp.float32)
    out = jax.block_until_ready(value_critic_forward(x, packed))
    ref = value_critic_reference(x, params, NUM_LAYERS)
    assert out.shape == (B, 1), out.shape
    assert jnp.allclose(out, ref, atol=1e-4, rtol=1e-4), float(jnp.max(jnp.abs(out - ref)))

    # f32, multi-tile grid with batch padding (B % tile_b != 0, 2 grid steps)
    B2 = 200
    x2 = jax.random.normal(kx2, (B2, STATE_DIM), jnp.float32)
    out2 = jax.block_until_ready(value_critic_forward(x2, packed, tile_b=128))
    ref2 = value_critic_reference(x2, params, NUM_LAYERS)
    assert out2.shape == (B2, 1), out2.shape
    assert jnp.allclose(out2, ref2, atol=1e-4, rtol=1e-4), float(jnp.max(jnp.abs(out2 - ref2)))

    # bf16 params/activations: native bf16 MXU operands, f32 accumulation.
    # (Activations are rounded to bf16 before each matmul, unlike the f32
    # reference, hence the loose tolerance.)
    xb = x.astype(jnp.bfloat16)
    pb = jax.tree_util.tree_map(lambda a: a.astype(jnp.bfloat16), params)
    packed_b = pack_value_critic_params(pb)
    outb = jax.block_until_ready(value_critic_forward(xb, packed_b))
    refb = value_critic_reference(xb, pb, NUM_LAYERS)
    assert outb.shape == (B, 1), outb.shape
    assert jnp.allclose(outb.astype(jnp.float32), refb, atol=1e-1, rtol=1e-1), \
        float(jnp.max(jnp.abs(outb.astype(jnp.float32) - refb)))

    print("KERNEL_OK")
</pallas_src>

<mosaic_0001>
module attributes {stable_mosaic.version = 11 : i64} {
  func.func @kernel(%arg0: i32, %arg1: memref<16x32xf32, #tpu.memory_space<vmem>>, %arg2: memref<32x128xf32, #tpu.memory_space<vmem>>, %arg3: memref<128x128xf32, #tpu.memory_space<vmem>>, %arg4: memref<128x128xf32, #tpu.memory_space<vmem>>, %arg5: memref<11x128xf32, #tpu.memory_space<vmem>>, %arg6: memref<1x16xf32, #tpu.memory_space<vmem>>) attributes {dimension_semantics = [#tpu.dimension_semantics<parallel>], iteration_bounds = array<i64: 1>, scalar_prefetch = 0 : i64, scratch_operands = 0 : i64, tpu.core_type = #tpu.core_type<tc>, window_params = [{transform_indices = @transform_0, window_bounds = array<i64: 16, 32>}, {pipeline_mode = #tpu.pipeline_mode<synchronous>, transform_indices = @transform_1, window_bounds = array<i64: 32, 128>}, {pipeline_mode = #tpu.pipeline_mode<synchronous>, transform_indices = @transform_2, window_bounds = array<i64: 128, 128>}, {pipeline_mode = #tpu.pipeline_mode<synchronous>, transform_indices = @transform_3, window_bounds = array<i64: 128, 128>}, {pipeline_mode = #tpu.pipeline_mode<synchronous>, transform_indices = @transform_4, window_bounds = array<i64: 11, 128>}, {transform_indices = @transform_5, window_bounds = array<i64: 1, 16>}]} {
    %c0 = arith.constant 0 : index
    %c0_0 = arith.constant 0 : index
    %0 = vector.load %arg1[%c0, %c0_0] : memref<16x32xf32, #tpu.memory_space<vmem>>, vector<16x32xf32>
    %c0_1 = arith.constant 0 : index
    %c0_2 = arith.constant 0 : index
    %1 = vector.load %arg2[%c0_1, %c0_2] : memref<32x128xf32, #tpu.memory_space<vmem>>, vector<32x128xf32>
    %cst = arith.constant dense<0.000000e+00> : vector<16x128xf32>
    %2 = tpu.matmul %0, %1, %cst {dimension_numbers = #tpu.dot_dimension_numbers<[1], [0], [0], [1], [0, 0, 1, 1], [], []>} : vector<16x32xf32>, vector<32x128xf32>, vector<16x128xf32> -> vector<16x128xf32>
    %c0_3 = arith.constant 0 : index
    %c0_4 = arith.constant 0 : index
    %3 = vector.load %arg5[%c0_3, %c0_4] : memref<11x128xf32, #tpu.memory_space<vmem>>, vector<1x128xf32>
    %c1 = arith.constant 1 : index
    %c0_5 = arith.constant 0 : index
    %4 = vector.load %arg5[%c1, %c0_5] : memref<11x128xf32, #tpu.memory_space<vmem>>, vector<1x128xf32>
    %c2 = arith.constant 2 : index
    %c0_6 = arith.constant 0 : index
    %5 = vector.load %arg5[%c2, %c0_6] : memref<11x128xf32, #tpu.memory_space<vmem>>, vector<1x128xf32>
    %6 = vector.broadcast %3 : vector<1x128xf32> to vector<16x128xf32>
    %7 = arith.addf %2, %6 : vector<16x128xf32>
    %cst_7 = arith.constant dense<0.000000e+00> : vector<16xf32>
    %8 = vector.multi_reduction <add>, %7, %cst_7 [1] : vector<16x128xf32> to vector<16xf32>
    %9 = vector.shape_cast %8 : vector<16xf32> to vector<16x1xf32>
    %cst_8 = arith.constant 1.280000e+02 : f32
    %10 = vector.broadcast %cst_8 : f32 to vector<16x1xf32>
    %11 = arith.divf %9, %10 : vector<16x1xf32>
    %12 = vector.broadcast %11 : vector<16x1xf32> to vector<16x128xf32>
    %13 = arith.subf %7, %12 : vector<16x128xf32>
    %14 = arith.mulf %13, %13 : vector<16x128xf32>
    %cst_9 = arith.constant dense<0.000000e+00> : vector<16xf32>
    %15 = vector.multi_reduction <add>, %14, %cst_9 [1] : vector<16x128xf32> to vector<16xf32>
    %16 = vector.shape_cast %15 : vector<16xf32> to vector<16x1xf32>
    %cst_10 = arith.constant 1.280000e+02 : f32
    %17 = vector.broadcast %cst_10 : f32 to vector<16x1xf32>
    %18 = arith.divf %16, %17 : vector<16x1xf32>
    %cst_11 = arith.constant 9.99999974E-6 : f32
    %19 = vector.broadcast %cst_11 : f32 to vector<16x1xf32>
    %20 = arith.addf %18, %19 : vector<16x1xf32>
    %21 = math.rsqrt %20 : vector<16x1xf32>
    %22 = vector.broadcast %21 : vector<16x1xf32> to vector<16x128xf32>
    %23 = arith.mulf %13, %22 : vector<16x128xf32>
    %24 = vector.broadcast %4 : vector<1x128xf32> to vector<16x128xf32>
    %25 = arith.mulf %23, %24 : vector<16x128xf32>
    %26 = vector.broadcast %5 : vector<1x128xf32> to vector<16x128xf32>
    %27 = arith.addf %25, %26 : vector<16x128xf32>
    %cst_12 = arith.constant 0.000000e+00 : f32
    %28 = vector.broadcast %cst_12 : f32 to vector<16x128xf32>
    %29 = arith.maximumf %27, %28 : vector<16x128xf32>
    %c0_13 = arith.constant 0 : index
    %c0_14 = arith.constant 0 : index
    %30 = vector.load %arg3[%c0_13, %c0_14] : memref<128x128xf32, #tpu.memory_space<vmem>>, vector<128x128xf32>
    %cst_15 = arith.constant dense<0.000000e+00> : vector<16x128xf32>
    %31 = tpu.matmul %29, %30, %cst_15 {dimension_numbers = #tpu.dot_dimension_numbers<[1], [0], [0], [1], [0, 0, 1, 1], [], []>} : vector<16x128xf32>, vector<128x128xf32>, vector<16x128xf32> -> vector<16x128xf32>
    %c3 = arith.constant 3 : index
    %c0_16 = arith.constant 0 : index
    %32 = vector.load %arg5[%c3, %c0_16] : memref<11x128xf32, #tpu.memory_space<vmem>>, vector<1x128xf32>
    %c4 = arith.constant 4 : index
    %c0_17 = arith.constant 0 : index
    %33 = vector.load %arg5[%c4, %c0_17] : memref<11x128xf32, #tpu.memory_space<vmem>>, vector<1x128xf32>
    %c5 = arith.constant 5 : index
    %c0_18 = arith.constant 0 : index
    %34 = vector.load %arg5[%c5, %c0_18] : memref<11x128xf32, #tpu.memory_space<vmem>>, vector<1x128xf32>
    %35 = vector.broadcast %32 : vector<1x128xf32> to vector<16x128xf32>
    %36 = arith.addf %31, %35 : vector<16x128xf32>
    %cst_19 = arith.constant dense<0.000000e+00> : vector<16xf32>
    %37 = vector.multi_reduction <add>, %36, %cst_19 [1] : vector<16x128xf32> to vector<16xf32>
    %38 = vector.shape_cast %37 : vector<16xf32> to vector<16x1xf32>
    %cst_20 = arith.constant 1.280000e+02 : f32
    %39 = vector.broadcast %cst_20 : f32 to vector<16x1xf32>
    %40 = arith.divf %38, %39 : vector<16x1xf32>
    %41 = vector.broadcast %40 : vector<16x1xf32> to vector<16x128xf32>
    %42 = arith.subf %36, %41 : vector<16x128xf32>
    %43 = arith.mulf %42, %42 : vector<16x128xf32>
    %cst_21 = arith.constant dense<0.000000e+00> : vector<16xf32>
    %44 = vector.multi_reduction <add>, %43, %cst_21 [1] : vector<16x128xf32> to vector<16xf32>
    %45 = vector.shape_cast %44 : vector<16xf32> to vector<16x1xf32>
    %cst_22 = arith.constant 1.280000e+02 : f32
    %46 = vector.broadcast %cst_22 : f32 to vector<16x1xf32>
    %47 = arith.divf %45, %46 : vector<16x1xf32>
    %cst_23 = arith.constant 9.99999974E-6 : f32
    %48 = vector.broadcast %cst_23 : f32 to vector<16x1xf32>
    %49 = arith.addf %47, %48 : vector<16x1xf32>
    %50 = math.rsqrt %49 : vector<16x1xf32>
    %51 = vector.broadcast %50 : vector<16x1xf32> to vector<16x128xf32>
    %52 = arith.mulf %42, %51 : vector<16x128xf32>
    %53 = vector.broadcast %33 : vector<1x128xf32> to vector<16x128xf32>
    %54 = arith.mulf %52, %53 : vector<16x128xf32>
    %55 = vector.broadcast %34 : vector<1x128xf32> to vector<16x128xf32>
    %56 = arith.addf %54, %55 : vector<16x128xf32>
    %cst_24 = arith.constant 0.000000e+00 : f32
    %57 = vector.broadcast %cst_24 : f32 to vector<16x128xf32>
    %58 = arith.maximumf %56, %57 : vector<16x128xf32>
    %c0_25 = arith.constant 0 : index
    %c0_26 = arith.constant 0 : index
    %59 = vector.load %arg4[%c0_25, %c0_26] : memref<128x128xf32, #tpu.memory_space<vmem>>, vector<128x128xf32>
    %cst_27 = arith.constant dense<0.000000e+00> : vector<16x128xf32>
    %60 = tpu.matmul %58, %59, %cst_27 {dimension_numbers = #tpu.dot_dimension_numbers<[1], [0], [0], [1], [0, 0, 1, 1], [], []>} : vector<16x128xf32>, vector<128x128xf32>, vector<16x128xf32> -> vector<16x128xf32>
    %c6 = arith.constant 6 : index
    %c0_28 = arith.constant 0 : index
    %61 = vector.load %arg5[%c6, %c0_28] : memref<11x128xf32, #tpu.memory_space<vmem>>, vector<1x128xf32>
    %c7 = arith.constant 7 : index
    %c0_29 = arith.constant 0 : index
    %62 = vector.load %arg5[%c7, %c0_29] : memref<11x128xf32, #tpu.memory_space<vmem>>, vector<1x128xf32>
    %c8 = arith.constant 8 : index
    %c0_30 = arith.constant 0 : index
    %63 = vector.load %arg5[%c8, %c0_30] : memref<11x128xf32, #tpu.memory_space<vmem>>, vector<1x128xf32>
    %64 = vector.broadcast %61 : vector<1x128xf32> to vector<16x128xf32>
    %65 = arith.addf %60, %64 : vector<16x128xf32>
    %cst_31 = arith.constant dense<0.000000e+00> : vector<16xf32>
    %66 = vector.multi_reduction <add>, %65, %cst_31 [1] : vector<16x128xf32> to vector<16xf32>
    %67 = vector.shape_cast %66 : vector<16xf32> to vector<16x1xf32>
    %cst_32 = arith.constant 1.280000e+02 : f32
    %68 = vector.broadcast %cst_32 : f32 to vector<16x1xf32>
    %69 = arith.divf %67, %68 : vector<16x1xf32>
    %70 = vector.broadcast %69 : vector<16x1xf32> to vector<16x128xf32>
    %71 = arith.subf %65, %70 : vector<16x128xf32>
    %72 = arith.mulf %71, %71 : vector<16x128xf32>
    %cst_33 = arith.constant dense<0.000000e+00> : vector<16xf32>
    %73 = vector.multi_reduction <add>, %72, %cst_33 [1] : vector<16x128xf32> to vector<16xf32>
    %74 = vector.shape_cast %73 : vector<16xf32> to vector<16x1xf32>
    %cst_34 = arith.constant 1.280000e+02 : f32
    %75 = vector.broadcast %cst_34 : f32 to vector<16x1xf32>
    %76 = arith.divf %74, %75 : vector<16x1xf32>
    %cst_35 = arith.constant 9.99999974E-6 : f32
    %77 = vector.broadcast %cst_35 : f32 to vector<16x1xf32>
    %78 = arith.addf %76, %77 : vector<16x1xf32>
    %79 = math.rsqrt %78 : vector<16x1xf32>
    %80 = vector.broadcast %79 : vector<16x1xf32> to vector<16x128xf32>
    %81 = arith.mulf %71, %80 : vector<16x128xf32>
    %82 = vector.broadcast %62 : vector<1x128xf32> to vector<16x128xf32>
    %83 = arith.mulf %81, %82 : vector<16x128xf32>
    %84 = vector.broadcast %63 : vector<1x128xf32> to vector<16x128xf32>
    %85 = arith.addf %83, %84 : vector<16x128xf32>
    %cst_36 = arith.constant 0.000000e+00 : f32
    %86 = vector.broadcast %cst_36 : f32 to vector<16x128xf32>
    %87 = arith.maximumf %85, %86 : vector<16x128xf32>
    %c9 = arith.constant 9 : index
    %c0_37 = arith.constant 0 : index
    %88 = vector.load %arg5[%c9, %c0_37] : memref<11x128xf32, #tpu.memory_space<vmem>>, vector<1x128xf32>
    %c10 = arith.constant 10 : index
    %c0_38 = arith.constant 0 : index
    %89 = vector.load %arg5[%c10, %c0_38] : memref<11x128xf32, #tpu.memory_space<vmem>>, vector<1x1xf32>
    %cst_39 = arith.constant dense<0.000000e+00> : vector<1x16xf32>
    %90 = tpu.matmul %88, %87, %cst_39 {dimension_numbers = #tpu.dot_dimension_numbers<[1], [1], [0], [0], [0, 0, 1, 0], [], []>} : vector<1x128xf32>, vector<16x128xf32>, vector<1x16xf32> -> vector<1x16xf32>
    %91 = vector.broadcast %89 : vector<1x1xf32> to vector<1x16xf32>
    %92 = arith.addf %90, %91 : vector<1x16xf32>
    %c0_40 = arith.constant 0 : index
    %c0_41 = arith.constant 0 : index
    %93 = vector.load %arg6[%c0_40, %c0_41] : memref<1x16xf32, #tpu.memory_space<vmem>>, vector<1x16xf32>
    tpu.vector_store %arg6[%c0_40, %c0_41], %92 {strides = array<i32>} : memref<1x16xf32, #tpu.memory_space<vmem>>, vector<1x16xf32>,
    return
  }
  func.func @transform_0(%arg0: i32) -> (i32, i32) {
    %c0_i32 = arith.constant 0 : i32
    %c0_i32_0 = arith.constant 0 : i32
    return %arg0, %c0_i32 : i32, i32
  }
  func.func @transform_1(%arg0: i32) -> (i32, i32) {
    %c0_i32 = arith.constant 0 : i32
    %c0_i32_0 = arith.constant 0 : i32
    %c0_i32_1 = arith.constant 0 : i32
    return %c0_i32, %c0_i32_0 : i32, i32
  }
  func.func @transform_2(%arg0: i32) -> (i32, i32) {
    %c0_i32 = arith.constant 0 : i32
    %c0_i32_0 = arith.constant 0 : i32
    %c0_i32_1 = arith.constant 0 : i32
    return %c0_i32, %c0_i32_0 : i32, i32
  }
  func.func @transform_3(%arg0: i32) -> (i32, i32) {
    %c0_i32 = arith.constant 0 : i32
    %c0_i32_0 = arith.constant 0 : i32
    %c0_i32_1 = arith.constant 0 : i32
    return %c0_i32, %c0_i32_0 : i32, i32
  }
  func.func @transform_4(%arg0: i32) -> (i32, i32) {
    %c0_i32 = arith.constant 0 : i32
    %c0_i32_0 = arith.constant 0 : i32
    %c0_i32_1 = arith.constant 0 : i32
    return %c0_i32, %c0_i32_0 : i32, i32
  }
  func.func @transform_5(%arg0: i32) -> (i32, i32) {
    %c0_i32 = arith.constant 0 : i32
    %c0_i32_0 = arith.constant 0 : i32
    return %c0_i32, %arg0 : i32, i32
  }
}

module attributes {stable_mosaic.version = 11 : i64} {
  func.func @kernel(%arg0: i32, %arg1: memref<16x32xf32, #tpu.memory_space<vmem>>, %arg2: memref<32x128xf32, #tpu.memory_space<vmem>>, %arg3: memref<128x128xf32, #tpu.memory_space<vmem>>, %arg4: memref<128x128xf32, #tpu.memory_space<vmem>>, %arg5: memref<11x128xf32, #tpu.memory_space<vmem>>, %arg6: memref<1x16xf32, #tpu.memory_space<vmem>>) attributes {dimension_semantics = [#tpu.dimension_semantics<parallel>], iteration_bounds = array<i64: 1>, scalar_prefetch = 0 : i64, scratch_operands = 0 : i64, tpu.core_type = #tpu.core_type<tc>, window_params = [{transform_indices = @transform_0, window_bounds = array<i64: 16, 32>}, {pipeline_mode = #tpu.pipeline_mode<synchronous>, transform_indices = @transform_1, window_bounds = array<i64: 32, 128>}, {pipeline_mode = #tpu.pipeline_mode<synchronous>, transform_indices = @transform_2, window_bounds = array<i64: 128, 128>}, {pipeline_mode = #tpu.pipeline_mode<synchronous>, transform_indices = @transform_3, window_bounds = array<i64: 128, 128>}, {pipeline_mode = #tpu.pipeline_mode<synchronous>, transform_indices = @transform_4, window_bounds = array<i64: 11, 128>}, {transform_indices = @transform_5, window_bounds = array<i64: 1, 16>}]} {
    %c0 = arith.constant 0 : index
    %c0_0 = arith.constant 0 : index
    %0 = vector.load %arg1[%c0, %c0_0] : memref<16x32xf32, #tpu.memory_space<vmem>>, vector<16x32xf32>
    %c0_1 = arith.constant 0 : index
    %c0_2 = arith.constant 0 : index
    %1 = vector.load %arg2[%c0_1, %c0_2] : memref<32x128xf32, #tpu.memory_space<vmem>>, vector<32x128xf32>
    %cst = arith.constant dense<0.000000e+00> : vector<16x128xf32>
    %2 = tpu.matmul %0, %1, %cst {dimension_numbers = #tpu.dot_dimension_numbers<[1], [0], [0], [1], [0, 0, 1, 1], [], []>} : vector<16x32xf32>, vector<32x128xf32>, vector<16x128xf32> -> vector<16x128xf32>
    %c0_3 = arith.constant 0 : index
    %c0_4 = arith.constant 0 : index
    %3 = vector.load %arg5[%c0_3, %c0_4] : memref<11x128xf32, #tpu.memory_space<vmem>>, vector<1x128xf32>
    %c1 = arith.constant 1 : index
    %c0_5 = arith.constant 0 : index
    %4 = vector.load %arg5[%c1, %c0_5] : memref<11x128xf32, #tpu.memory_space<vmem>>, vector<1x128xf32>
    %c2 = arith.constant 2 : index
    %c0_6 = arith.constant 0 : index
    %5 = vector.load %arg5[%c2, %c0_6] : memref<11x128xf32, #tpu.memory_space<vmem>>, vector<1x128xf32>
    %6 = vector.broadcast %3 : vector<1x128xf32> to vector<16x128xf32>
    %7 = arith.addf %2, %6 : vector<16x128xf32>
    %cst_7 = arith.constant dense<0.000000e+00> : vector<16xf32>
    %8 = vector.multi_reduction <add>, %7, %cst_7 [1] : vector<16x128xf32> to vector<16xf32>
    %9 = vector.shape_cast %8 : vector<16xf32> to vector<16x1xf32>
    %cst_8 = arith.constant 1.280000e+02 : f32
    %10 = vector.broadcast %cst_8 : f32 to vector<16x1xf32>
    %11 = arith.divf %9, %10 : vector<16x1xf32>
    %12 = vector.broadcast %11 : vector<16x1xf32> to vector<16x128xf32>
    %13 = arith.subf %7, %12 : vector<16x128xf32>
    %14 = arith.mulf %13, %13 : vector<16x128xf32>
    %cst_9 = arith.constant dense<0.000000e+00> : vector<16xf32>
    %15 = vector.multi_reduction <add>, %14, %cst_9 [1] : vector<16x128xf32> to vector<16xf32>
    %16 = vector.shape_cast %15 : vector<16xf32> to vector<16x1xf32>
    %cst_10 = arith.constant 1.280000e+02 : f32
    %17 = vector.broadcast %cst_10 : f32 to vector<16x1xf32>
    %18 = arith.divf %16, %17 : vector<16x1xf32>
    %cst_11 = arith.constant 9.99999974E-6 : f32
    %19 = vector.broadcast %cst_11 : f32 to vector<16x1xf32>
    %20 = arith.addf %18, %19 : vector<16x1xf32>
    %21 = math.rsqrt %20 : vector<16x1xf32>
    %22 = vector.broadcast %21 : vector<16x1xf32> to vector<16x128xf32>
    %23 = arith.mulf %13, %22 : vector<16x128xf32>
    %24 = vector.broadcast %4 : vector<1x128xf32> to vector<16x128xf32>
    %25 = arith.mulf %23, %24 : vector<16x128xf32>
    %26 = vector.broadcast %5 : vector<1x128xf32> to vector<16x128xf32>
    %27 = arith.addf %25, %26 : vector<16x128xf32>
    %cst_12 = arith.constant 0.000000e+00 : f32
    %28 = vector.broadcast %cst_12 : f32 to vector<16x128xf32>
    %29 = arith.maximumf %27, %28 : vector<16x128xf32>
    %c0_13 = arith.constant 0 : index
    %c0_14 = arith.constant 0 : index
    %30 = vector.load %arg3[%c0_13, %c0_14] : memref<128x128xf32, #tpu.memory_space<vmem>>, vector<128x128xf32>
    %cst_15 = arith.constant dense<0.000000e+00> : vector<16x128xf32>
    %31 = tpu.matmul %29, %30, %cst_15 {dimension_numbers = #tpu.dot_dimension_numbers<[1], [0], [0], [1], [0, 0, 1, 1], [], []>} : vector<16x128xf32>, vector<128x128xf32>, vector<16x128xf32> -> vector<16x128xf32>
    %c3 = arith.constant 3 : index
    %c0_16 = arith.constant 0 : index
    %32 = vector.load %arg5[%c3, %c0_16] : memref<11x128xf32, #tpu.memory_space<vmem>>, vector<1x128xf32>
    %c4 = arith.constant 4 : index
    %c0_17 = arith.constant 0 : index
    %33 = vector.load %arg5[%c4, %c0_17] : memref<11x128xf32, #tpu.memory_space<vmem>>, vector<1x128xf32>
    %c5 = arith.constant 5 : index
    %c0_18 = arith.constant 0 : index
    %34 = vector.load %arg5[%c5, %c0_18] : memref<11x128xf32, #tpu.memory_space<vmem>>, vector<1x128xf32>
    %35 = vector.broadcast %32 : vector<1x128xf32> to vector<16x128xf32>
    %36 = arith.addf %31, %35 : vector<16x128xf32>
    %cst_19 = arith.constant dense<0.000000e+00> : vector<16xf32>
    %37 = vector.multi_reduction <add>, %36, %cst_19 [1] : vector<16x128xf32> to vector<16xf32>
    %38 = vector.shape_cast %37 : vector<16xf32> to vector<16x1xf32>
    %cst_20 = arith.constant 1.280000e+02 : f32
    %39 = vector.broadcast %cst_20 : f32 to vector<16x1xf32>
    %40 = arith.divf %38, %39 : vector<16x1xf32>
    %41 = vector.broadcast %40 : vector<16x1xf32> to vector<16x128xf32>
    %42 = arith.subf %36, %41 : vector<16x128xf32>
    %43 = arith.mulf %42, %42 : vector<16x128xf32>
    %cst_21 = arith.constant dense<0.000000e+00> : vector<16xf32>
    %44 = vector.multi_reduction <add>, %43, %cst_21 [1] : vector<16x128xf32> to vector<16xf32>
    %45 = vector.shape_cast %44 : vector<16xf32> to vector<16x1xf32>
    %cst_22 = arith.constant 1.280000e+02 : f32
    %46 = vector.broadcast %cst_22 : f32 to vector<16x1xf32>
    %47 = arith.divf %45, %46 : vector<16x1xf32>
    %cst_23 = arith.constant 9.99999974E-6 : f32
    %48 = vector.broadcast %cst_23 : f32 to vector<16x1xf32>
    %49 = arith.addf %47, %48 : vector<16x1xf32>
    %50 = math.rsqrt %49 : vector<16x1xf32>
    %51 = vector.broadcast %50 : vector<16x1xf32> to vector<16x128xf32>
    %52 = arith.mulf %42, %51 : vector<16x128xf32>
    %53 = vector.broadcast %33 : vector<1x128xf32> to vector<16x128xf32>
    %54 = arith.mulf %52, %53 : vector<16x128xf32>
    %55 = vector.broadcast %34 : vector<1x128xf32> to vector<16x128xf32>
    %56 = arith.addf %54, %55 : vector<16x128xf32>
    %cst_24 = arith.constant 0.000000e+00 : f32
    %57 = vector.broadcast %cst_24 : f32 to vector<16x128xf32>
    %58 = arith.maximumf %56, %57 : vector<16x128xf32>
    %c0_25 = arith.constant 0 : index
    %c0_26 = arith.constant 0 : index
    %59 = vector.load %arg4[%c0_25, %c0_26] : memref<128x128xf32, #tpu.memory_space<vmem>>, vector<128x128xf32>
    %cst_27 = arith.constant dense<0.000000e+00> : vector<16x128xf32>
    %60 = tpu.matmul %58, %59, %cst_27 {dimension_numbers = #tpu.dot_dimension_numbers<[1], [0], [0], [1], [0, 0, 1, 1], [], []>} : vector<16x128xf32>, vector<128x128xf32>, vector<16x128xf32> -> vector<16x128xf32>
    %c6 = arith.constant 6 : index
    %c0_28 = arith.constant 0 : index
    %61 = vector.load %arg5[%c6, %c0_28] : memref<11x128xf32, #tpu.memory_space<vmem>>, vector<1x128xf32>
    %c7 = arith.constant 7 : index
    %c0_29 = arith.constant 0 : index
    %62 = vector.load %arg5[%c7, %c0_29] : memref<11x128xf32, #tpu.memory_space<vmem>>, vector<1x128xf32>
    %c8 = arith.constant 8 : index
    %c0_30 = arith.constant 0 : index
    %63 = vector.load %arg5[%c8, %c0_30] : memref<11x128xf32, #tpu.memory_space<vmem>>, vector<1x128xf32>
    %64 = vector.broadcast %61 : vector<1x128xf32> to vector<16x128xf32>
    %65 = arith.addf %60, %64 : vector<16x128xf32>
    %cst_31 = arith.constant dense<0.000000e+00> : vector<16xf32>
    %66 = vector.multi_reduction <add>, %65, %cst_31 [1] : vector<16x128xf32> to vector<16xf32>
    %67 = vector.shape_cast %66 : vector<16xf32> to vector<16x1xf32>
    %cst_32 = arith.constant 1.280000e+02 : f32
    %68 = vector.broadcast %cst_32 : f32 to vector<16x1xf32>
    %69 = arith.divf %67, %68 : vector<16x1xf32>
    %70 = vector.broadcast %69 : vector<16x1xf32> to vector<16x128xf32>
    %71 = arith.subf %65, %70 : vector<16x128xf32>
    %72 = arith.mulf %71, %71 : vector<16x128xf32>
    %cst_33 = arith.constant dense<0.000000e+00> : vector<16xf32>
    %73 = vector.multi_reduction <add>, %72, %cst_33 [1] : vector<16x128xf32> to vector<16xf32>
    %74 = vector.shape_cast %73 : vector<16xf32> to vector<16x1xf32>
    %cst_34 = arith.constant 1.280000e+02 : f32
    %75 = vector.broadcast %cst_34 : f32 to vector<16x1xf32>
    %76 = arith.divf %74, %75 : vector<16x1xf32>
    %cst_35 = arith.constant 9.99999974E-6 : f32
    %77 = vector.broadcast %cst_35 : f32 to vector<16x1xf32>
    %78 = arith.addf %76, %77 : vector<16x1xf32>
    %79 = math.rsqrt %78 : vector<16x1xf32>
    %80 = vector.broadcast %79 : vector<16x1xf32> to vector<16x128xf32>
    %81 = arith.mulf %71, %80 : vector<16x128xf32>
    %82 = vector.broadcast %62 : vector<1x128xf32> to vector<16x128xf32>
    %83 = arith.mulf %81, %82 : vector<16x128xf32>
    %84 = vector.broadcast %63 : vector<1x128xf32> to vector<16x128xf32>
    %85 = arith.addf %83, %84 : vector<16x128xf32>
    %cst_36 = arith.constant 0.000000e+00 : f32
    %86 = vector.broadcast %cst_36 : f32 to vector<16x128xf32>
    %87 = arith.maximumf %85, %86 : vector<16x128xf32>
    %c9 = arith.constant 9 : index
    %c0_37 = arith.constant 0 : index
    %88 = vector.load %arg5[%c9, %c0_37] : memref<11x128xf32, #tpu.memory_space<vmem>>, vector<1x128xf32>
    %c10 = arith.constant 10 : index
    %c0_38 = arith.constant 0 : index
    %89 = vector.load %arg5[%c10, %c0_38] : memref<11x128xf32, #tpu.memory_space<vmem>>, vector<1x1xf32>
    %cst_39 = arith.constant dense<0.000000e+00> : vector<1x16xf32>
    %90 = tpu.matmul %88, %87, %cst_39 {dimension_numbers = #tpu.dot_dimension_numbers<[1], [1], [0], [0], [0, 0, 1, 0], [], []>} : vector<1x128xf32>, vector<16x128xf32>, vector<1x16xf32> -> vector<1x16xf32>
    %91 = vector.broadcast %89 : vector<1x1xf32> to vector<1x16xf32>
    %92 = arith.addf %90, %91 : vector<1x16xf32>
    %c0_40 = arith.constant 0 : index
    %c0_41 = arith.constant 0 : index
    %93 = vector.load %arg6[%c0_40, %c0_41] : memref<1x16xf32, #tpu.memory_space<vmem>>, vector<1x16xf32>
    tpu.vector_store %arg6[%c0_40, %c0_41], %92 {strides = array<i32>} : memref<1x16xf32, #tpu.memory_space<vmem>>, vector<1x16xf32>,
    return
  }
  func.func @transform_0(%arg0: i32) -> (i32, i32) {
    %c0_i32 = arith.constant 0 : i32
    %c0_i32_0 = arith.constant 0 : i32
    return %arg0, %c0_i32 : i32, i32
  }
  func.func @transform_1(%arg0: i32) -> (i32, i32) {
    %c0_i32 = arith.constant 0 : i32
    %c0_i32_0 = arith.constant 0 : i32
    %c0_i32_1 = arith.constant 0 : i32
    return %c0_i32, %c0_i32_0 : i32, i32
  }
  func.func @transform_2(%arg0: i32) -> (i32, i32) {
    %c0_i32 = arith.constant 0 : i32
    %c0_i32_0 = arith.constant 0 : i32
    %c0_i32_1 = arith.constant 0 : i32
    return %c0_i32, %c0_i32_0 : i32, i32
  }
  func.func @transform_3(%arg0: i32) -> (i32, i32) {
    %c0_i32 = arith.constant 0 : i32
    %c0_i32_0 = arith.constant 0 : i32
    %c0_i32_1 = arith.constant 0 : i32
    return %c0_i32, %c0_i32_0 : i32, i32
  }
  func.func @transform_4(%arg0: i32) -> (i32, i32) {
    %c0_i32 = arith.constant 0 : i32
    %c0_i32_0 = arith.constant 0 : i32
    %c0_i32_1 = arith.constant 0 : i32
    return %c0_i32, %c0_i32_0 : i32, i32
  }
  func.func @transform_5(%arg0: i32) -> (i32, i32) {
    %c0_i32 = arith.constant 0 : i32
    %c0_i32_0 = arith.constant 0 : i32
    return %c0_i32, %arg0 : i32, i32
  }
}

</mosaic_0001>

<bundles_post_ra>
// kernel: tpu_custom_call.1
= control target key start
LH: loop header
LB: loop body
LE: loop exit
PB: predicated region body
PF: predicated region fallthrough
CT: control target
= control target key end

     0   :  { %10 = vsyncpa [#allocation3], 0  ;;  %s694_s0 = inlined_call_operand.hbm [shape: f32[16,32], index: 0, kind: input, shape index: {}]   ;;  %s695_s1 = inlined_call_operand.hbm [shape: f32[32,128], index: 1, kind: input, shape index: {}]   ;;  %s696_s2 = inlined_call_operand.hbm [shape: f32[128,128], index: 2, kind: input, shape index: {}]   ;;  %s697_s3 = inlined_call_operand.hbm [shape: f32[128,128], index: 3, kind: input, shape index: {}]   ;;  %s698_s4 = inlined_call_operand.hbm [shape: f32[11,128], index: 4, kind: input, shape index: {}]   ;;  %s699_s5 = inlined_call_operand.hbm [shape: f32[1,16], index: 5, kind: output, shape index: {}]  }
   0x1   :  { %11 = vsyncpa [#allocation6], 0 }
   0x2   :  { %12 = vsyncpa [#allocation9], 0 }
   0x3   :  { %13 = vsyncpa [#allocation4], 0  ;;  %s31_s20 = sshll.u32 %s695_s1, 4  ;;  %s612_s21 = smov [#allocation5]   ;;  %s32_s20 = int_to_ptr.hbm [resolvable:$true] %s31_s20 }
   0x4   :  { %s33_s22 = sshll.u32 %s612_s21, 4  ;;  %s57_s25 = sshll.u32 %s697_s3, 4  ;;  %s34_s22 = int_to_ptr.vmem [resolvable:$true] %s33_s22  ;;  %s58_s25 = int_to_ptr.hbm [resolvable:$true] %s57_s25 }
   0x5   :  { %s613_s26 = smov 128   ;;  %s614_s27 = smov 8  }
   0x6   :  { %39 = dma.hbm_to_vmem [thread:$0]  %s32_s20, 512, %s34_s22, [#allocation6], %s613_s26, %s613_s26, %s614_s27  }
   0x7   :  { %s615_s28 = smov [#allocation8]   ;;  %s18_s7 = sshll.u32 %s694_s0, 4  ;;  %s19_s7 = int_to_ptr.hbm [resolvable:$true] %s18_s7 }
   0x8   :  { %s59_s29 = sshll.u32 %s615_s28, 4  ;;  %s44_s9 = sshll.u32 %s696_s2, 4  ;;  %s60_s29 = int_to_ptr.vmem [resolvable:$true] %s59_s29  ;;  %s45_s9 = int_to_ptr.hbm [resolvable:$true] %s44_s9 }
   0x9   :  { %65 = dma.hbm_to_vmem [thread:$0]  %s58_s25, 2048, %s60_s29, [#allocation9], %s613_s26, %s613_s26, %s614_s27  }
   0xa   :  { %s616_s10 = smov [#allocation2]   ;;  %s617_s3 = smov [#allocation7]  }
   0xb   :  { %s20_s11 = sshll.u32 %s616_s10, 4  ;;  %s46_s12 = sshll.u32 %s617_s3, 4  ;;  %s21_s11 = int_to_ptr.vmem [resolvable:$true] %s20_s11  ;;  %s47_s12 = int_to_ptr.vmem [resolvable:$true] %s46_s12 }
   0xc   :  { %26 = dma.hbm_to_vmem [thread:$0]  %s19_s7, 256, %s21_s11, [#allocation3], %s613_s26, %s613_s26, %s614_s27  }
   0xd   :  { %s70_s15 = sshll.u32 %s698_s4, 4  ;;  %s618_s0 = smov [#allocation10]   ;;  %s71_s15 = int_to_ptr.hbm [resolvable:$true] %s70_s15 }
   0xe   :  { %52 = dma.hbm_to_vmem [thread:$0]  %s45_s9, 2048, %s47_s12, [#allocation6], %s613_s26, %s613_s26, %s614_s27  }
   0xf   :  { %s72_s16 = sshll.u32 %s618_s0, 4  ;;  %s73_s16 = int_to_ptr.vmem [resolvable:$true] %s72_s16 }
  0x10   :  { %78 = dma.hbm_to_vmem [thread:$0]  %s71_s15, 256, %s73_s16, [#allocation9], %s613_s26, %s613_s26, %s614_s27  }
  0x11   :  { %604 = dma.done.wait [#allocation3], 256  }
  0x12   :  { %605 = vsyncadd [#allocation3], 4294967040 }
  0x13   :  { %606 = dma.done.wait [#allocation6], 2560  }
  0x14   :  { %607 = vsyncadd [#allocation6], 4294964736 }
  0x15   :  { %608 = dma.done.wait [#allocation9], 2304  }
  0x16   :  { %609 = vsyncadd [#allocation9], 4294964992  ;;  %v104_v0 = vld [vmem:[#allocation5 + $0x18] sm:$0xff]  ;;  %v103_v1 = vld [vmem:[#allocation5 + $0x10] sm:$0xff]  ;;  %vm109_vm0 = vcmask 261120   ;;  %v619_v11 = vmov 128.0  }
  0x17   :  { %128 = vmatpush.msra.mxu0 %v104_v0  ;;  %v102_v2 = vld [vmem:[#allocation5 + $0x8] sm:$0xff]  ;;  %v101_v3 = vld [vmem:[#allocation5] sm:$0xff]  ;;  %v99_v4 = vld [vmem:[#allocation2] sm:$0xff]  ;;  %446 = vrcp.f32 %v619_v11  ;;  %s621_s2 = smov [#allocation11]   ;;  %s412_s19 = sshll.u32 %s699_s5, 4  ;;  %s413_s19 = int_to_ptr.hbm [resolvable:$true] %s412_s19 }
  0x18   :  { %v100_v5 = vld [vmem:[#allocation2 + $0x8] sm:$0xff]  ;;  %v437_v6 = vld [vmem:[#allocation10] ss:$0 sm:$0xff]  ;;  %v208_v27 = vld [vmem:[#allocation7 + $0x70] sm:$0xff]  ;;  %s410_s4 = sshll.u32 %s621_s2, 4  ;;  %s411_s4 = int_to_ptr.vmem [resolvable:$true] %s410_s4 }
  0x19   :  { %129 = vmatpush.msra.mxu0 %v103_v1  ;;  %v209_v14 = vld [vmem:[#allocation7 + $0x78] sm:$0xff]  ;;  %v207_v28 = vld [vmem:[#allocation7 + $0x68] sm:$0xff]  ;;  %v206_v29 = vld [vmem:[#allocation7 + $0x60] sm:$0xff] }
  0x1a   :  { %214 = vmatpush.msra.mxu1 %v209_v14  ;;  %v205_v30 = vld [vmem:[#allocation7 + $0x58] sm:$0xff]  ;;  %v204_v31 = vld [vmem:[#allocation7 + $0x50] sm:$0xff]  ;;  %v203_v32 = vld [vmem:[#allocation7 + $0x48] sm:$0xff] }
  0x1b   :  { %130 = vmatpush.msra.mxu0 %v102_v2  ;;  %v202_v33 = vld [vmem:[#allocation7 + $0x40] sm:$0xff]  ;;  %v201_v34 = vld [vmem:[#allocation7 + $0x38] sm:$0xff]  ;;  %v200_v35 = vld [vmem:[#allocation7 + $0x30] sm:$0xff] }
  0x1c   :  { %215 = vmatpush.msra.mxu1 %v208_v27  ;;  %v199_v36 = vld [vmem:[#allocation7 + $0x28] sm:$0xff]  ;;  %v198_v37 = vld [vmem:[#allocation7 + $0x20] sm:$0xff]  ;;  %v197_v38 = vld [vmem:[#allocation7 + $0x18] sm:$0xff] }
  0x1d   :  { %131 = vmatpush.msra.mxu0 %v101_v3  ;;  %v447_v12 = vpop.eup %446  ;;  %v196_v39 = vld [vmem:[#allocation7 + $0x10] sm:$0xff]  ;;  %v195_v40 = vld [vmem:[#allocation7 + $0x8] sm:$0xff]  ;;  %v194_v41 = vld [vmem:[#allocation7] sm:$0xff] }
  0x1e   :  { %424 = vmatmul.msk.f32.vlgmr.msra.gmra.mxu0 %vm109_vm0, %v99_v4  ;;  %v144_v13 = vmul.f32 128.0, %v447_v12  ;;  %vm148_vm1 = vweird.f32 %v447_v12  ;;  %216 = vmatpush.msra.mxu1 %v207_v28  ;;  %v438_v56 = vld [vmem:[#allocation10 + $0x1] ss:$0 sm:$0xff]  ;;  %v439_v60 = vld [vmem:[#allocation10 + $0x2] ss:$0 sm:$0xff]  ;;  %v295_v27 = vld [vmem:[#allocation8 + $0x50] sm:$0xff] }
  0x1f   :  { %v294_v28 = vld [vmem:[#allocation8 + $0x48] sm:$0xff] }
  0x20   :  { %v145_v15 = vsub.f32 1.0, %v144_v13  ;;  %217 = vmatpush.msra.mxu1 %v206_v29  ;;  %v300_v13 = vld [vmem:[#allocation8 + $0x78] sm:$0xff]  ;;  %v293_v29 = vld [vmem:[#allocation8 + $0x40] sm:$0xff] }
  0x21   :  { %305 = vmatpush.msra.mxu2 %v300_v13 }
  0x22   :  { %v146_v16 = vmul.f32 %v447_v12, %v145_v15  ;;  %218 = vmatpush.msra.mxu1 %v205_v30  ;;  %v292_v30 = vld [vmem:[#allocation8 + $0x38] sm:$0xff] }
  0x24   :  { %v147_v17 = vadd.f32 %v447_v12, %v146_v16  ;;  %219 = vmatpush.msra.mxu1 %v204_v31  ;;  %v291_v31 = vld [vmem:[#allocation8 + $0x30] sm:$0xff] }
  0x26   :  { %425 = vmatmul.msk.f32.gmra.mxu0 %vm109_vm0, %v100_v5  ;;  %v667_v18 = vsel %vm148_vm1, %v447_v12, %v147_v17  ;;  %220 = vmatpush.msra.mxu1 %v203_v32  ;;  %v290_v32 = vld [vmem:[#allocation8 + $0x28] sm:$0xff] }
  0x28   :  { %221 = vmatpush.msra.mxu1 %v202_v33  ;;  %v289_v33 = vld [vmem:[#allocation8 + $0x20] sm:$0xff] }
  0x2a   :  { %222 = vmatpush.msra.mxu1 %v201_v34  ;;  %v288_v34 = vld [vmem:[#allocation8 + $0x18] sm:$0xff] }
  0x2c   :  { %223 = vmatpush.msra.mxu1 %v200_v35  ;;  %v287_v35 = vld [vmem:[#allocation8 + $0x10] sm:$0xff] }
  0x2e   :  { %224 = vmatpush.msra.mxu1 %v199_v36  ;;  %v286_v36 = vld [vmem:[#allocation8 + $0x8] sm:$0xff] }
  0x30   :  { %225 = vmatpush.msra.mxu1 %v198_v37  ;;  %v285_v37 = vld [vmem:[#allocation8] sm:$0xff] }
  0x32   :  { %226 = vmatpush.msra.mxu1 %v197_v38 }
  0x34   :  { %227 = vmatpush.msra.mxu1 %v196_v39 }
  0x36   :  { %228 = vmatpush.msra.mxu1 %v195_v40 }
  0x38   :  { %229 = vmatpush.msra.mxu1 %v194_v41 }
  0x9b   :  { %v133_v7 = vpop.f32.mrf.mxu0 }
  0x9c   :  { %v134_v8 = vadd.f32 %v437_v6, %v133_v7 }
  0x9e   :  { %139 = vadd.xlane.f32.xlu0 %v134_v8 }
  0xa3   :  { %v136_v9 = vpop.f32.mrf.mxu0 }
  0xa4   :  { %v137_v10 = vadd.f32 %v437_v6, %v136_v9 }
  0xa6   :  { %141 = vadd.xlane.f32.xlu0 %v137_v10 }
 0x111   :  { %v140_v19 = vpop.xlane.xlu0 %139 }
 0x112   :  { %v150_v20 = vmul.f32 %v667_v18, %v140_v19 }
 0x114   :  { %v152_v21 = vsub.f32 %v134_v8, %v150_v20  ;;  %v440_v8 = vld [vmem:[#allocation10 + $0x3] ss:$0 sm:$0xff] }
 0x116   :  { %v154_v22 = vmul.f32 %v152_v21, %v152_v21 }
 0x118   :  { %156 = vadd.xlane.f32.xlu1 %v154_v22 }
 0x119   :  { %v142_v23 = vpop.xlane.xlu0 %141 }
 0x11a   :  { %v151_v24 = vmul.f32 %v667_v18, %v142_v23  ;;  %v299_v23 = vld [vmem:[#allocation8 + $0x70] sm:$0xff] }
 0x11b   :  { %306 = vmatpush.msra.mxu2 %v299_v23 }
 0x11c   :  { %v671_v25 = vsub.f32 %v137_v10, %v151_v24  ;;  %v298_v24 = vld [vmem:[#allocation8 + $0x68] sm:$0xff] }
 0x11d   :  { %307 = vmatpush.msra.mxu2 %v298_v24 }
 0x11e   :  { %v155_v26 = vmul.f32 %v671_v25, %v671_v25 }
 0x120   :  { %158 = vadd.xlane.f32.xlu1 %v155_v26  ;;  %v296_v26 = vld [vmem:[#allocation8 + $0x58] sm:$0xff] }
 0x18b   :  { %v157_v42 = vpop.xlane.xlu1 %156 }
 0x18c   :  { %v160_v43 = vmul.f32 %v157_v42, %v667_v18 }
 0x18e   :  { %v162_v44 = vadd.f32 1e-05, %v160_v43 }
 0x190   :  { %448 = vrsqrt.f32 %v162_v44  ;;  %vm170_vm3 = vweird.f32 %v162_v44 }
 0x193   :  { %v159_v45 = vpop.xlane.xlu1 %158 }
 0x194   :  { %v161_v46 = vmul.f32 %v159_v45, %v667_v18 }
 0x196   :  { %v449_v47 = vpop.eup %448  ;;  %v163_v48 = vadd.f32 1e-05, %v161_v46 }
 0x197   :  { %v165_v49 = vmul.f32 %v449_v47, %v162_v44  ;;  %vm171_vm2 = vweird.f32 %v449_v47 }
 0x198   :  { %450 = vrsqrt.f32 %v163_v48  ;;  %vm172_vm4 = vmor %vm170_vm3, %vm171_vm2  ;;  %vm180_vm6 = vweird.f32 %v163_v48 }
 0x199   :  { %v166_v50 = vmul.f32 %v449_v47, %v165_v49 }
 0x19b   :  { %v167_v51 = vmul.f32 0.5, %v166_v50 }
 0x19d   :  { %v168_v52 = vsub.f32 1.5, %v167_v51 }
 0x19e   :  { %v451_v53 = vpop.eup %450 }
 0x19f   :  { %v169_v54 = vmul.f32 %v449_v47, %v168_v52  ;;  %v175_v55 = vmul.f32 %v451_v53, %v163_v48  ;;  %vm181_vm5 = vweird.f32 %v451_v53  ;;  %v441_v52 = vld [vmem:[#allocation10 + $0x4] ss:$0 sm:$0xff] }
 0x1a0   :  { %vm182_vm7 = vmor %vm180_vm6, %vm181_vm5 }
 0x1a1   :  { %v176_v57 = vmul.f32 %v451_v53, %v175_v55  ;;  %v173_v58 = vsel %vm172_vm4, %v449_v47, %v169_v54  ;;  %vm403_vm4 = vcmask 122880  }
 0x1a2   :  { %v184_v59 = vmul.f32 %v173_v58, %v152_v21 }
 0x1a3   :  { %v177_v61 = vmul.f32 0.5, %v176_v57 }
 0x1a4   :  { %v187_v62 = vmul.f32 %v438_v56, %v184_v59 }
 0x1a5   :  { %v178_v63 = vsub.f32 1.5, %v177_v61 }
 0x1a6   :  { %v190_v0 = vadd.f32 %v439_v60, %v187_v62 }
 0x1a7   :  { %v179_v1 = vmul.f32 %v451_v53, %v178_v63 }
 0x1a8   :  { %v192_v2 = vmax.f32 %v190_v0, 0.0 }
 0x1a9   :  { %v183_v3 = vsel %vm182_vm7, %v451_v53, %v179_v1 }
 0x1aa   :  { %230 = vmatmul.f32.vlgmr.msra.gmra.mxu1 %v192_v2  ;;  %v185_v4 = vmul.f32 %v183_v3, %v671_v25  ;;  %v297_v25 = vld [vmem:[#allocation8 + $0x60] sm:$0xff] }
 0x1ab   :  { %308 = vmatpush.msra.mxu2 %v297_v25 }
 0x1ac   :  { %v188_v5 = vmul.f32 %v438_v56, %v185_v4  ;;  %v442_v56 = vld [vmem:[#allocation10 + $0x5] ss:$0 sm:$0xff]  ;;  %v443_v4 = vld [vmem:[#allocation10 + $0x6] ss:$0 sm:$0xff] }
 0x1ad   :  { %309 = vmatpush.msra.mxu2 %v296_v26 }
 0x1ae   :  { %v191_v6 = vadd.f32 %v439_v60, %v188_v5 }
 0x1af   :  { %310 = vmatpush.msra.mxu2 %v295_v27  ;;  %v377_v27 = vld [vmem:[#allocation10 + $0xa] sm:$0x1] }
 0x1b0   :  { %v193_v7 = vmax.f32 %v191_v6, 0.0 }
 0x1b1   :  { %311 = vmatpush.msra.mxu2 %v294_v28  ;;  %v620_v28 = vmov 0  }
 0x1b2   :  { %233 = vmatmul.f32.gmra.mxu1 %v193_v7  ;;  %436 = vset.pattern.permute.xlu0 %v620_v28 }
 0x1b3   :  { %312 = vmatpush.msra.mxu2 %v293_v29 }
 0x1b5   :  { %313 = vmatpush.msra.mxu2 %v292_v30 }
 0x1b7   :  { %314 = vmatpush.msra.mxu2 %v291_v31 }
 0x1b9   :  { %315 = vmatpush.msra.mxu2 %v290_v32 }
 0x1bb   :  { %316 = vmatpush.msra.mxu2 %v289_v33 }
 0x1bd   :  { %317 = vmatpush.msra.mxu2 %v288_v34 }
 0x1bf   :  { %318 = vmatpush.msra.mxu2 %v287_v35 }
 0x1c1   :  { %319 = vmatpush.msra.mxu2 %v286_v36 }
 0x1c3   :  { %320 = vmatpush.msra.mxu2 %v285_v37 }
 0x227   :  { %v231_v9 = vpop.f32.mrf.mxu1 }
 0x228   :  { %v232_v10 = vadd.f32 %v440_v8, %v231_v9 }
 0x22a   :  { %237 = vadd.xlane.f32.xlu2 %v232_v10 }
 0x22f   :  { %v234_v11 = vpop.f32.mrf.mxu1 }
 0x230   :  { %v235_v12 = vadd.f32 %v440_v8, %v234_v11 }
 0x232   :  { %239 = vadd.xlane.f32.xlu2 %v235_v12 }
 0x29d   :  { %v238_v14 = vpop.xlane.xlu2 %237 }
 0x29e   :  { %v241_v15 = vmul.f32 %v238_v14, %v667_v18 }
 0x2a0   :  { %v243_v16 = vsub.f32 %v232_v10, %v241_v15 }
 0x2a2   :  { %v245_v17 = vmul.f32 %v243_v16, %v243_v16 }
 0x2a4   :  { %247 = vadd.xlane.f32.xlu0 %v245_v17 }
 0x2a5   :  { %v240_v19 = vpop.xlane.xlu2 %239 }
 0x2a6   :  { %v242_v20 = vmul.f32 %v240_v19, %v667_v18 }
 0x2a8   :  { %v680_v21 = vsub.f32 %v235_v12, %v242_v20 }
 0x2aa   :  { %v246_v22 = vmul.f32 %v680_v21, %v680_v21 }
 0x2ac   :  { %249 = vadd.xlane.f32.xlu1 %v246_v22 }
 0x317   :  { %v248_v38 = vpop.xlane.xlu0 %247 }
 0x318   :  { %v251_v39 = vmul.f32 %v248_v38, %v667_v18  ;;  %v444_v38 = vld [vmem:[#allocation10 + $0x7] ss:$0 sm:$0xff] }
 0x31a   :  { %v253_v40 = vadd.f32 1e-05, %v251_v39 }
 0x31c   :  { %452 = vrsqrt.f32 %v253_v40  ;;  %vm261_vm9 = vweird.f32 %v253_v40 }
 0x31f   :  { %v250_v41 = vpop.xlane.xlu1 %249 }
 0x320   :  { %v252_v42 = vmul.f32 %v250_v41, %v667_v18 }
 0x322   :  { %v453_v43 = vpop.eup %452  ;;  %v254_v44 = vadd.f32 1e-05, %v252_v42 }
 0x323   :  { %v256_v45 = vmul.f32 %v453_v43, %v253_v40  ;;  %vm262_vm8 = vweird.f32 %v453_v43 }
 0x324   :  { %454 = vrsqrt.f32 %v254_v44  ;;  %vm263_vm10 = vmor %vm261_vm9, %vm262_vm8  ;;  %vm271_vm12 = vweird.f32 %v254_v44 }
 0x325   :  { %v257_v46 = vmul.f32 %v453_v43, %v256_v45 }
 0x327   :  { %v258_v47 = vmul.f32 0.5, %v257_v46 }
 0x329   :  { %v259_v48 = vsub.f32 1.5, %v258_v47 }
 0x32a   :  { %v455_v49 = vpop.eup %454 }
 0x32b   :  { %v260_v50 = vmul.f32 %v453_v43, %v259_v48  ;;  %v266_v51 = vmul.f32 %v455_v49, %v254_v44  ;;  %vm272_vm11 = vweird.f32 %v455_v49 }
 0x32c   :  { %vm273_vm13 = vmor %vm271_vm12, %vm272_vm11 }
 0x32d   :  { %v267_v53 = vmul.f32 %v455_v49, %v266_v51  ;;  %v264_v54 = vsel %vm263_vm10, %v453_v43, %v260_v50  ;;  %v445_v43 = vld [vmem:[#allocation10 + $0x8] ss:$0 sm:$0xff] }
 0x32e   :  { %v275_v55 = vmul.f32 %v264_v54, %v243_v16 }
 0x32f   :  { %v268_v57 = vmul.f32 0.5, %v267_v53 }
 0x330   :  { %v278_v58 = vmul.f32 %v441_v52, %v275_v55 }
 0x331   :  { %v269_v59 = vsub.f32 1.5, %v268_v57 }
 0x332   :  { %v281_v60 = vadd.f32 %v442_v56, %v278_v58 }
 0x333   :  { %v270_v61 = vmul.f32 %v455_v49, %v269_v59 }
 0x334   :  { %v283_v62 = vmax.f32 %v281_v60, 0.0 }
 0x335   :  { %v274_v63 = vsel %vm273_vm13, %v455_v49, %v270_v61  ;;  %v376_v49 = vld [vmem:[#allocation10 + $0x9] sm:$0x1] }
 0x336   :  { %321 = vmatmul.f32.vlgmr.msra.gmra.mxu2 %v283_v62  ;;  %v276_v0 = vmul.f32 %v274_v63, %v680_v21 }
 0x338   :  { %v279_v1 = vmul.f32 %v441_v52, %v276_v0 }
 0x33a   :  { %v282_v2 = vadd.f32 %v442_v56, %v279_v1 }
 0x33c   :  { %v284_v3 = vmax.f32 %v282_v2, 0.0 }
 0x33e   :  { %324 = vmatmul.f32.gmra.mxu2 %v284_v3 }
 0x3b9   :  { %v322_v5 = vpop.f32.mrf.mxu2 }
 0x3ba   :  { %v323_v6 = vadd.f32 %v443_v4, %v322_v5 }
 0x3bc   :  { %328 = vadd.xlane.f32.xlu0 %v323_v6 }
 0x3c1   :  { %v325_v7 = vpop.f32.mrf.mxu2 }
 0x3c2   :  { %v326_v8 = vadd.f32 %v443_v4, %v325_v7 }
 0x3c4   :  { %330 = vadd.xlane.f32.xlu2 %v326_v8 }
 0x3d0   :  { %380 = vperm.xlu0 %436, %v377_v27  }
 0x42f   :  { %v329_v9 = vpop.xlane.xlu0 %328 }
 0x430   :  { %v332_v10 = vmul.f32 %v329_v9, %v667_v18 }
 0x432   :  { %v334_v11 = vsub.f32 %v323_v6, %v332_v10 }
 0x434   :  { %v336_v12 = vmul.f32 %v334_v11, %v334_v11 }
 0x436   :  { %338 = vadd.xlane.f32.xlu2 %v336_v12 }
 0x437   :  { %v331_v13 = vpop.xlane.xlu2 %330 }
 0x438   :  { %v333_v14 = vmul.f32 %v331_v13, %v667_v18 }
 0x43a   :  { %v335_v15 = vsub.f32 %v326_v8, %v333_v14 }
 0x43c   :  { %v337_v16 = vmul.f32 %v335_v15, %v335_v15 }
 0x43e   :  { %340 = vadd.xlane.f32.xlu1 %v337_v16 }
 0x442   :  { %v381_v50 = vpop.permute.xlu0 %380 }
 0x4a9   :  { %v339_v17 = vpop.xlane.xlu2 %338 }
 0x4aa   :  { %v342_v19 = vmul.f32 %v339_v17, %v667_v18 }
 0x4ac   :  { %v344_v20 = vadd.f32 1e-05, %v342_v19 }
 0x4ae   :  { %456 = vrsqrt.f32 %v344_v20  ;;  %vm352_vm15 = vweird.f32 %v344_v20 }
 0x4b1   :  { %v341_v21 = vpop.xlane.xlu1 %340 }
 0x4b2   :  { %v343_v22 = vmul.f32 %v341_v21, %v667_v18 }
 0x4b4   :  { %v457_v23 = vpop.eup %456  ;;  %v345_v24 = vadd.f32 1e-05, %v343_v22 }
 0x4b5   :  { %v347_v25 = vmul.f32 %v457_v23, %v344_v20  ;;  %vm353_vm14 = vweird.f32 %v457_v23 }
 0x4b6   :  { %458 = vrsqrt.f32 %v345_v24  ;;  %vm354_vm0 = vmor %vm352_vm15, %vm353_vm14  ;;  %vm362_vm2 = vweird.f32 %v345_v24 }
 0x4b7   :  { %v348_v26 = vmul.f32 %v457_v23, %v347_v25 }
 0x4b9   :  { %v349_v29 = vmul.f32 0.5, %v348_v26 }
 0x4bb   :  { %v350_v30 = vsub.f32 1.5, %v349_v29 }
 0x4bc   :  { %v459_v31 = vpop.eup %458 }
 0x4bd   :  { %v357_v32 = vmul.f32 %v459_v31, %v345_v24  ;;  %v351_v33 = vmul.f32 %v457_v23, %v350_v30  ;;  %vm363_vm1 = vweird.f32 %v459_v31 }
 0x4be   :  { %vm364_vm3 = vmor %vm362_vm2, %vm363_vm1 }
 0x4bf   :  { %v358_v34 = vmul.f32 %v459_v31, %v357_v32  ;;  %v355_v36 = vsel %vm354_vm0, %v457_v23, %v351_v33 }
 0x4c0   :  { %v366_v39 = vmul.f32 %v355_v36, %v334_v11 }
 0x4c1   :  { %v359_v35 = vmul.f32 0.5, %v358_v34 }
 0x4c2   :  { %v369_v44 = vmul.f32 %v444_v38, %v366_v39 }
 0x4c3   :  { %v360_v18 = vsub.f32 1.5, %v359_v35 }
 0x4c4   :  { %v372_v47 = vadd.f32 %v445_v43, %v369_v44 }
 0x4c5   :  { %v361_v37 = vmul.f32 %v459_v31, %v360_v18 }
 0x4c6   :  { %v374_v48 = vmax.f32 %v372_v47, 0.0 }
 0x4c7   :  { %v365_v40 = vsel %vm364_vm3, %v459_v31, %v361_v37 }
 0x4c8   :  { %v367_v41 = vmul.f32 %v365_v40, %v335_v15 }
 0x4ca   :  { %v370_v42 = vmul.f32 %v444_v38, %v367_v41 }
 0x4cc   :  { %v373_v45 = vadd.f32 %v445_v43, %v370_v42 }
 0x4ce   :  { %v375_v46 = vmax.f32 %v373_v45, 0.0 }
 0x4d0   :  { %397 = vmatpush.xpose.msra.mxu3 %v375_v46 }
 0x4d4   :  { %398 = vmatpush.xpose.msra.mxu3 %v374_v48 }
 0x4d7   :  { %399 = vmatmul.f32.vlgmr.msra.gmra.mxu3 %v376_v49 }
 0x55a   :  { %v400_v51 = vpop.f32.mrf.mxu3 }
 0x55b   :  { %v401_v52 = vadd.f32 %v400_v51, %v381_v50 }
 0x55d   :  { %404 = vst.msk [vmem:[#allocation11] sm:$0x1] %vm403_vm4, %v401_v52 }
 0x55e   :  { %415 = dma.vmem_to_hbm [thread:$0]  %s411_s4, 16, %s413_s19, [#allocation4]  }
 0x55f   :  { %610 = dma.done.wait [#allocation4], 16  }
 0x560   :  { %611 = vsyncadd [#allocation4], 4294967280 }
 0x561   :  { %420 = vsyncpa [#allocation3], 1 }
 0x562   :  { %421 = vsyncpa [#allocation6], 1 }
 0x563   :  { %422 = vsyncpa [#allocation9], 1 }
 0x564   :  { %423 = vsyncpa [#allocation4], 1 }

// kernel: tpu_custom_call.1
= control target key start
LH: loop header
LB: loop body
LE: loop exit
PB: predicated region body
PF: predicated region fallthrough
CT: control target
= control target key end

     0   :  { %10 = vsyncpa [#allocation3], 0  ;;  %s694_s0 = inlined_call_operand.hbm [shape: f32[16,32], index: 0, kind: input, shape index: {}]   ;;  %s695_s1 = inlined_call_operand.hbm [shape: f32[32,128], index: 1, kind: input, shape index: {}]   ;;  %s696_s2 = inlined_call_operand.hbm [shape: f32[128,128], index: 2, kind: input, shape index: {}]   ;;  %s697_s3 = inlined_call_operand.hbm [shape: f32[128,128], index: 3, kind: input, shape index: {}]   ;;  %s698_s4 = inlined_call_operand.hbm [shape: f32[11,128], index: 4, kind: input, shape index: {}]   ;;  %s699_s5 = inlined_call_operand.hbm [shape: f32[1,16], index: 5, kind: output, shape index: {}]  }
   0x1   :  { %11 = vsyncpa [#allocation6], 0 }
   0x2   :  { %12 = vsyncpa [#allocation9], 0 }
   0x3   :  { %13 = vsyncpa [#allocation4], 0  ;;  %s31_s20 = sshll.u32 %s695_s1, 4  ;;  %s612_s21 = smov [#allocation5]   ;;  %s32_s20 = int_to_ptr.hbm [resolvable:$true] %s31_s20 }
   0x4   :  { %s33_s22 = sshll.u32 %s612_s21, 4  ;;  %s57_s25 = sshll.u32 %s697_s3, 4  ;;  %s34_s22 = int_to_ptr.vmem [resolvable:$true] %s33_s22  ;;  %s58_s25 = int_to_ptr.hbm [resolvable:$true] %s57_s25 }
   0x5   :  { %s613_s26 = smov 128   ;;  %s614_s27 = smov 8  }
   0x6   :  { %39 = dma.hbm_to_vmem [thread:$0]  %s32_s20, 512, %s34_s22, [#allocation6], %s613_s26, %s613_s26, %s614_s27  }
   0x7   :  { %s615_s28 = smov [#allocation8]   ;;  %s18_s7 = sshll.u32 %s694_s0, 4  ;;  %s19_s7 = int_to_ptr.hbm [resolvable:$true] %s18_s7 }
   0x8   :  { %s59_s29 = sshll.u32 %s615_s28, 4  ;;  %s44_s9 = sshll.u32 %s696_s2, 4  ;;  %s60_s29 = int_to_ptr.vmem [resolvable:$true] %s59_s29  ;;  %s45_s9 = int_to_ptr.hbm [resolvable:$true] %s44_s9 }
   0x9   :  { %65 = dma.hbm_to_vmem [thread:$0]  %s58_s25, 2048, %s60_s29, [#allocation9], %s613_s26, %s613_s26, %s614_s27  }
   0xa   :  { %s616_s10 = smov [#allocation2]   ;;  %s617_s3 = smov [#allocation7]  }
   0xb   :  { %s20_s11 = sshll.u32 %s616_s10, 4  ;;  %s46_s12 = sshll.u32 %s617_s3, 4  ;;  %s21_s11 = int_to_ptr.vmem [resolvable:$true] %s20_s11  ;;  %s47_s12 = int_to_ptr.vmem [resolvable:$true] %s46_s12 }
   0xc   :  { %26 = dma.hbm_to_vmem [thread:$0]  %s19_s7, 256, %s21_s11, [#allocation3], %s613_s26, %s613_s26, %s614_s27  }
   0xd   :  { %s70_s15 = sshll.u32 %s698_s4, 4  ;;  %s618_s0 = smov [#allocation10]   ;;  %s71_s15 = int_to_ptr.hbm [resolvable:$true] %s70_s15 }
   0xe   :  { %52 = dma.hbm_to_vmem [thread:$0]  %s45_s9, 2048, %s47_s12, [#allocation6], %s613_s26, %s613_s26, %s614_s27  }
   0xf   :  { %s72_s16 = sshll.u32 %s618_s0, 4  ;;  %s73_s16 = int_to_ptr.vmem [resolvable:$true] %s72_s16 }
  0x10   :  { %78 = dma.hbm_to_vmem [thread:$0]  %s71_s15, 256, %s73_s16, [#allocation9], %s613_s26, %s613_s26, %s614_s27  }
  0x11   :  { %604 = dma.done.wait [#allocation3], 256  }
  0x12   :  { %605 = vsyncadd [#allocation3], 4294967040 }
  0x13   :  { %606 = dma.done.wait [#allocation6], 2560  }
  0x14   :  { %607 = vsyncadd [#allocation6], 4294964736 }
  0x15   :  { %608 = dma.done.wait [#allocation9], 2304  }
  0x16   :  { %609 = vsyncadd [#allocation9], 4294964992  ;;  %v104_v0 = vld [vmem:[#allocation5 + $0x18] sm:$0xff]  ;;  %v103_v1 = vld [vmem:[#allocation5 + $0x10] sm:$0xff]  ;;  %vm109_vm0 = vcmask 261120   ;;  %v619_v11 = vmov 128.0  }
  0x17   :  { %128 = vmatpush.msra.mxu0 %v104_v0  ;;  %v102_v2 = vld [vmem:[#allocation5 + $0x8] sm:$0xff]  ;;  %v101_v3 = vld [vmem:[#allocation5] sm:$0xff]  ;;  %v99_v4 = vld [vmem:[#allocation2] sm:$0xff]  ;;  %446 = vrcp.f32 %v619_v11  ;;  %s621_s2 = smov [#allocation11]   ;;  %s412_s19 = sshll.u32 %s699_s5, 4  ;;  %s413_s19 = int_to_ptr.hbm [resolvable:$true] %s412_s19 }
  0x18   :  { %v100_v5 = vld [vmem:[#allocation2 + $0x8] sm:$0xff]  ;;  %v437_v6 = vld [vmem:[#allocation10] ss:$0 sm:$0xff]  ;;  %v208_v27 = vld [vmem:[#allocation7 + $0x70] sm:$0xff]  ;;  %s410_s4 = sshll.u32 %s621_s2, 4  ;;  %s411_s4 = int_to_ptr.vmem [resolvable:$true] %s410_s4 }
  0x19   :  { %129 = vmatpush.msra.mxu0 %v103_v1  ;;  %v209_v14 = vld [vmem:[#allocation7 + $0x78] sm:$0xff]  ;;  %v207_v28 = vld [vmem:[#allocation7 + $0x68] sm:$0xff]  ;;  %v206_v29 = vld [vmem:[#allocation7 + $0x60] sm:$0xff] }
  0x1a   :  { %214 = vmatpush.msra.mxu1 %v209_v14  ;;  %v205_v30 = vld [vmem:[#allocation7 + $0x58] sm:$0xff]  ;;  %v204_v31 = vld [vmem:[#allocation7 + $0x50] sm:$0xff]  ;;  %v203_v32 = vld [vmem:[#allocation7 + $0x48] sm:$0xff] }
  0x1b   :  { %130 = vmatpush.msra.mxu0 %v102_v2  ;;  %v202_v33 = vld [vmem:[#allocation7 + $0x40] sm:$0xff]  ;;  %v201_v34 = vld [vmem:[#allocation7 + $0x38] sm:$0xff]  ;;  %v200_v35 = vld [vmem:[#allocation7 + $0x30] sm:$0xff] }
  0x1c   :  { %215 = vmatpush.msra.mxu1 %v208_v27  ;;  %v199_v36 = vld [vmem:[#allocation7 + $0x28] sm:$0xff]  ;;  %v198_v37 = vld [vmem:[#allocation7 + $0x20] sm:$0xff]  ;;  %v197_v38 = vld [vmem:[#allocation7 + $0x18] sm:$0xff] }
  0x1d   :  { %131 = vmatpush.msra.mxu0 %v101_v3  ;;  %v447_v12 = vpop.eup %446  ;;  %v196_v39 = vld [vmem:[#allocation7 + $0x10] sm:$0xff]  ;;  %v195_v40 = vld [vmem:[#allocation7 + $0x8] sm:$0xff]  ;;  %v194_v41 = vld [vmem:[#allocation7] sm:$0xff] }
  0x1e   :  { %424 = vmatmul.msk.f32.vlgmr.msra.gmra.mxu0 %vm109_vm0, %v99_v4  ;;  %v144_v13 = vmul.f32 128.0, %v447_v12  ;;  %vm148_vm1 = vweird.f32 %v447_v12  ;;  %216 = vmatpush.msra.mxu1 %v207_v28  ;;  %v438_v56 = vld [vmem:[#allocation10 + $0x1] ss:$0 sm:$0xff]  ;;  %v439_v60 = vld [vmem:[#allocation10 + $0x2] ss:$0 sm:$0xff]  ;;  %v295_v27 = vld [vmem:[#allocation8 + $0x50] sm:$0xff] }
  0x1f   :  { %v294_v28 = vld [vmem:[#allocation8 + $0x48] sm:$0xff] }
  0x20   :  { %v145_v15 = vsub.f32 1.0, %v144_v13  ;;  %217 = vmatpush.msra.mxu1 %v206_v29  ;;  %v300_v13 = vld [vmem:[#allocation8 + $0x78] sm:$0xff]  ;;  %v293_v29 = vld [vmem:[#allocation8 + $0x40] sm:$0xff] }
  0x21   :  { %305 = vmatpush.msra.mxu2 %v300_v13 }
  0x22   :  { %v146_v16 = vmul.f32 %v447_v12, %v145_v15  ;;  %218 = vmatpush.msra.mxu1 %v205_v30  ;;  %v292_v30 = vld [vmem:[#allocation8 + $0x38] sm:$0xff] }
  0x24   :  { %v147_v17 = vadd.f32 %v447_v12, %v146_v16  ;;  %219 = vmatpush.msra.mxu1 %v204_v31  ;;  %v291_v31 = vld [vmem:[#allocation8 + $0x30] sm:$0xff] }
  0x26   :  { %425 = vmatmul.msk.f32.gmra.mxu0 %vm109_vm0, %v100_v5  ;;  %v667_v18 = vsel %vm148_vm1, %v447_v12, %v147_v17  ;;  %220 = vmatpush.msra.mxu1 %v203_v32  ;;  %v290_v32 = vld [vmem:[#allocation8 + $0x28] sm:$0xff] }
  0x28   :  { %221 = vmatpush.msra.mxu1 %v202_v33  ;;  %v289_v33 = vld [vmem:[#allocation8 + $0x20] sm:$0xff] }
  0x2a   :  { %222 = vmatpush.msra.mxu1 %v201_v34  ;;  %v288_v34 = vld [vmem:[#allocation8 + $0x18] sm:$0xff] }
  0x2c   :  { %223 = vmatpush.msra.mxu1 %v200_v35  ;;  %v287_v35 = vld [vmem:[#allocation8 + $0x10] sm:$0xff] }
  0x2e   :  { %224 = vmatpush.msra.mxu1 %v199_v36  ;;  %v286_v36 = vld [vmem:[#allocation8 + $0x8] sm:$0xff] }
  0x30   :  { %225 = vmatpush.msra.mxu1 %v198_v37  ;;  %v285_v37 = vld [vmem:[#allocation8] sm:$0xff] }
  0x32   :  { %226 = vmatpush.msra.mxu1 %v197_v38 }
  0x34   :  { %227 = vmatpush.msra.mxu1 %v196_v39 }
  0x36   :  { %228 = vmatpush.msra.mxu1 %v195_v40 }
  0x38   :  { %229 = vmatpush.msra.mxu1 %v194_v41 }
  0x9b   :  { %v133_v7 = vpop.f32.mrf.mxu0 }
  0x9c   :  { %v134_v8 = vadd.f32 %v437_v6, %v133_v7 }
  0x9e   :  { %139 = vadd.xlane.f32.xlu0 %v134_v8 }
  0xa3   :  { %v136_v9 = vpop.f32.mrf.mxu0 }
  0xa4   :  { %v137_v10 = vadd.f32 %v437_v6, %v136_v9 }
  0xa6   :  { %141 = vadd.xlane.f32.xlu0 %v137_v10 }
 0x111   :  { %v140_v19 = vpop.xlane.xlu0 %139 }
 0x112   :  { %v150_v20 = vmul.f32 %v667_v18, %v140_v19 }
 0x114   :  { %v152_v21 = vsub.f32 %v134_v8, %v150_v20  ;;  %v440_v8 = vld [vmem:[#allocation10 + $0x3] ss:$0 sm:$0xff] }
 0x116   :  { %v154_v22 = vmul.f32 %v152_v21, %v152_v21 }
 0x118   :  { %156 = vadd.xlane.f32.xlu1 %v154_v22 }
 0x119   :  { %v142_v23 = vpop.xlane.xlu0 %141 }
 0x11a   :  { %v151_v24 = vmul.f32 %v667_v18, %v142_v23  ;;  %v299_v23 = vld [vmem:[#allocation8 + $0x70] sm:$0xff] }
 0x11b   :  { %306 = vmatpush.msra.mxu2 %v299_v23 }
 0x11c   :  { %v671_v25 = vsub.f32 %v137_v10, %v151_v24  ;;  %v298_v24 = vld [vmem:[#allocation8 + $0x68] sm:$0xff] }
 0x11d   :  { %307 = vmatpush.msra.mxu2 %v298_v24 }
 0x11e   :  { %v155_v26 = vmul.f32 %v671_v25, %v671_v25 }
 0x120   :  { %158 = vadd.xlane.f32.xlu1 %v155_v26  ;;  %v296_v26 = vld [vmem:[#allocation8 + $0x58] sm:$0xff] }
 0x18b   :  { %v157_v42 = vpop.xlane.xlu1 %156 }
 0x18c   :  { %v160_v43 = vmul.f32 %v157_v42, %v667_v18 }
 0x18e   :  { %v162_v44 = vadd.f32 1e-05, %v160_v43 }
 0x190   :  { %448 = vrsqrt.f32 %v162_v44  ;;  %vm170_vm3 = vweird.f32 %v162_v44 }
 0x193   :  { %v159_v45 = vpop.xlane.xlu1 %158 }
 0x194   :  { %v161_v46 = vmul.f32 %v159_v45, %v667_v18 }
 0x196   :  { %v449_v47 = vpop.eup %448  ;;  %v163_v48 = vadd.f32 1e-05, %v161_v46 }
 0x197   :  { %v165_v49 = vmul.f32 %v449_v47, %v162_v44  ;;  %vm171_vm2 = vweird.f32 %v449_v47 }
 0x198   :  { %450 = vrsqrt.f32 %v163_v48  ;;  %vm172_vm4 = vmor %vm170_vm3, %vm171_vm2  ;;  %vm180_vm6 = vweird.f32 %v163_v48 }
 0x199   :  { %v166_v50 = vmul.f32 %v449_v47, %v165_v49 }
 0x19b   :  { %v167_v51 = vmul.f32 0.5, %v166_v50 }
 0x19d   :  { %v168_v52 = vsub.f32 1.5, %v167_v51 }
 0x19e   :  { %v451_v53 = vpop.eup %450 }
 0x19f   :  { %v169_v54 = vmul.f32 %v449_v47, %v168_v52  ;;  %v175_v55 = vmul.f32 %v451_v53, %v163_v48  ;;  %vm181_vm5 = vweird.f32 %v451_v53  ;;  %v441_v52 = vld [vmem:[#allocation10 + $0x4] ss:$0 sm:$0xff] }
 0x1a0   :  { %vm182_vm7 = vmor %vm180_vm6, %vm181_vm5 }
 0x1a1   :  { %v176_v57 = vmul.f32 %v451_v53, %v175_v55  ;;  %v173_v58 = vsel %vm172_vm4, %v449_v47, %v169_v54  ;;  %vm403_vm4 = vcmask 122880  }
 0x1a2   :  { %v184_v59 = vmul.f32 %v173_v58, %v152_v21 }
 0x1a3   :  { %v177_v61 = vmul.f32 0.5, %v176_v57 }
 0x1a4   :  { %v187_v62 = vmul.f32 %v438_v56, %v184_v59 }
 0x1a5   :  { %v178_v63 = vsub.f32 1.5, %v177_v61 }
 0x1a6   :  { %v190_v0 = vadd.f32 %v439_v60, %v187_v62 }
 0x1a7   :  { %v179_v1 = vmul.f32 %v451_v53, %v178_v63 }
 0x1a8   :  { %v192_v2 = vmax.f32 %v190_v0, 0.0 }
 0x1a9   :  { %v183_v3 = vsel %vm182_vm7, %v451_v53, %v179_v1 }
 0x1aa   :  { %230 = vmatmul.f32.vlgmr.msra.gmra.mxu1 %v192_v2  ;;  %v185_v4 = vmul.f32 %v183_v3, %v671_v25  ;;  %v297_v25 = vld [vmem:[#allocation8 + $0x60] sm:$0xff] }
 0x1ab   :  { %308 = vmatpush.msra.mxu2 %v297_v25 }
 0x1ac   :  { %v188_v5 = vmul.f32 %v438_v56, %v185_v4  ;;  %v442_v56 = vld [vmem:[#allocation10 + $0x5] ss:$0 sm:$0xff]  ;;  %v443_v4 = vld [vmem:[#allocation10 + $0x6] ss:$0 sm:$0xff] }
 0x1ad   :  { %309 = vmatpush.msra.mxu2 %v296_v26 }
 0x1ae   :  { %v191_v6 = vadd.f32 %v439_v60, %v188_v5 }
 0x1af   :  { %310 = vmatpush.msra.mxu2 %v295_v27  ;;  %v377_v27 = vld [vmem:[#allocation10 + $0xa] sm:$0x1] }
 0x1b0   :  { %v193_v7 = vmax.f32 %v191_v6, 0.0 }
 0x1b1   :  { %311 = vmatpush.msra.mxu2 %v294_v28  ;;  %v620_v28 = vmov 0  }
 0x1b2   :  { %233 = vmatmul.f32.gmra.mxu1 %v193_v7  ;;  %436 = vset.pattern.permute.xlu0 %v620_v28 }
 0x1b3   :  { %312 = vmatpush.msra.mxu2 %v293_v29 }
 0x1b5   :  { %313 = vmatpush.msra.mxu2 %v292_v30 }
 0x1b7   :  { %314 = vmatpush.msra.mxu2 %v291_v31 }
 0x1b9   :  { %315 = vmatpush.msra.mxu2 %v290_v32 }
 0x1bb   :  { %316 = vmatpush.msra.mxu2 %v289_v33 }
 0x1bd   :  { %317 = vmatpush.msra.mxu2 %v288_v34 }
 0x1bf   :  { %318 = vmatpush.msra.mxu2 %v287_v35 }
 0x1c1   :  { %319 = vmatpush.msra.mxu2 %v286_v36 }
 0x1c3   :  { %320 = vmatpush.msra.mxu2 %v285_v37 }
 0x227   :  { %v231_v9 = vpop.f32.mrf.mxu1 }
 0x228   :  { %v232_v10 = vadd.f32 %v440_v8, %v231_v9 }
 0x22a   :  { %237 = vadd.xlane.f32.xlu2 %v232_v10 }
 0x22f   :  { %v234_v11 = vpop.f32.mrf.mxu1 }
 0x230   :  { %v235_v12 = vadd.f32 %v440_v8, %v234_v11 }
 0x232   :  { %239 = vadd.xlane.f32.xlu2 %v235_v12 }
 0x29d   :  { %v238_v14 = vpop.xlane.xlu2 %237 }
 0x29e   :  { %v241_v15 = vmul.f32 %v238_v14, %v667_v18 }
 0x2a0   :  { %v243_v16 = vsub.f32 %v232_v10, %v241_v15 }
 0x2a2   :  { %v245_v17 = vmul.f32 %v243_v16, %v243_v16 }
 0x2a4   :  { %247 = vadd.xlane.f32.xlu0 %v245_v17 }
 0x2a5   :  { %v240_v19 = vpop.xlane.xlu2 %239 }
 0x2a6   :  { %v242_v20 = vmul.f32 %v240_v19, %v667_v18 }
 0x2a8   :  { %v680_v21 = vsub.f32 %v235_v12, %v242_v20 }
 0x2aa   :  { %v246_v22 = vmul.f32 %v680_v21, %v680_v21 }
 0x2ac   :  { %249 = vadd.xlane.f32.xlu1 %v246_v22 }
 0x317   :  { %v248_v38 = vpop.xlane.xlu0 %247 }
 0x318   :  { %v251_v39 = vmul.f32 %v248_v38, %v667_v18  ;;  %v444_v38 = vld [vmem:[#allocation10 + $0x7] ss:$0 sm:$0xff] }
 0x31a   :  { %v253_v40 = vadd.f32 1e-05, %v251_v39 }
 0x31c   :  { %452 = vrsqrt.f32 %v253_v40  ;;  %vm261_vm9 = vweird.f32 %v253_v40 }
 0x31f   :  { %v250_v41 = vpop.xlane.xlu1 %249 }
 0x320   :  { %v252_v42 = vmul.f32 %v250_v41, %v667_v18 }
 0x322   :  { %v453_v43 = vpop.eup %452  ;;  %v254_v44 = vadd.f32 1e-05, %v252_v42 }
 0x323   :  { %v256_v45 = vmul.f32 %v453_v43, %v253_v40  ;;  %vm262_vm8 = vweird.f32 %v453_v43 }
 0x324   :  { %454 = vrsqrt.f32 %v254_v44  ;;  %vm263_vm10 = vmor %vm261_vm9, %vm262_vm8  ;;  %vm271_vm12 = vweird.f32 %v254_v44 }
 0x325   :  { %v257_v46 = vmul.f32 %v453_v43, %v256_v45 }
 0x327   :  { %v258_v47 = vmul.f32 0.5, %v257_v46 }
 0x329   :  { %v259_v48 = vsub.f32 1.5, %v258_v47 }
 0x32a   :  { %v455_v49 = vpop.eup %454 }
 0x32b   :  { %v260_v50 = vmul.f32 %v453_v43, %v259_v48  ;;  %v266_v51 = vmul.f32 %v455_v49, %v254_v44  ;;  %vm272_vm11 = vweird.f32 %v455_v49 }
 0x32c   :  { %vm273_vm13 = vmor %vm271_vm12, %vm272_vm11 }
 0x32d   :  { %v267_v53 = vmul.f32 %v455_v49, %v266_v51  ;;  %v264_v54 = vsel %vm263_vm10, %v453_v43, %v260_v50  ;;  %v445_v43 = vld [vmem:[#allocation10 + $0x8] ss:$0 sm:$0xff] }
 0x32e   :  { %v275_v55 = vmul.f32 %v264_v54, %v243_v16 }
 0x32f   :  { %v268_v57 = vmul.f32 0.5, %v267_v53 }
 0x330   :  { %v278_v58 = vmul.f32 %v441_v52, %v275_v55 }
 0x331   :  { %v269_v59 = vsub.f32 1.5, %v268_v57 }
 0x332   :  { %v281_v60 = vadd.f32 %v442_v56, %v278_v58 }
 0x333   :  { %v270_v61 = vmul.f32 %v455_v49, %v269_v59 }
 0x334   :  { %v283_v62 = vmax.f32 %v281_v60, 0.0 }
 0x335   :  { %v274_v63 = vsel %vm273_vm13, %v455_v49, %v270_v61  ;;  %v376_v49 = vld [vmem:[#allocation10 + $0x9] sm:$0x1] }
 0x336   :  { %321 = vmatmul.f32.vlgmr.msra.gmra.mxu2 %v283_v62  ;;  %v276_v0 = vmul.f32 %v274_v63, %v680_v21 }
 0x338   :  { %v279_v1 = vmul.f32 %v441_v52, %v276_v0 }
 0x33a   :  { %v282_v2 = vadd.f32 %v442_v56, %v279_v1 }
 0x33c   :  { %v284_v3 = vmax.f32 %v282_v2, 0.0 }
 0x33e   :  { %324 = vmatmul.f32.gmra.mxu2 %v284_v3 }
 0x3b9   :  { %v322_v5 = vpop.f32.mrf.mxu2 }
 0x3ba   :  { %v323_v6 = vadd.f32 %v443_v4, %v322_v5 }
 0x3bc   :  { %328 = vadd.xlane.f32.xlu0 %v323_v6 }
 0x3c1   :  { %v325_v7 = vpop.f32.mrf.mxu2 }
 0x3c2   :  { %v326_v8 = vadd.f32 %v443_v4, %v325_v7 }
 0x3c4   :  { %330 = vadd.xlane.f32.xlu2 %v326_v8 }
 0x3d0   :  { %380 = vperm.xlu0 %436, %v377_v27  }
 0x42f   :  { %v329_v9 = vpop.xlane.xlu0 %328 }
 0x430   :  { %v332_v10 = vmul.f32 %v329_v9, %v667_v18 }
 0x432   :  { %v334_v11 = vsub.f32 %v323_v6, %v332_v10 }
 0x434   :  { %v336_v12 = vmul.f32 %v334_v11, %v334_v11 }
 0x436   :  { %338 = vadd.xlane.f32.xlu2 %v336_v12 }
 0x437   :  { %v331_v13 = vpop.xlane.xlu2 %330 }
 0x438   :  { %v333_v14 = vmul.f32 %v331_v13, %v667_v18 }
 0x43a   :  { %v335_v15 = vsub.f32 %v326_v8, %v333_v14 }
 0x43c   :  { %v337_v16 = vmul.f32 %v335_v15, %v335_v15 }
 0x43e   :  { %340 = vadd.xlane.f32.xlu1 %v337_v16 }
 0x442   :  { %v381_v50 = vpop.permute.xlu0 %380 }
 0x4a9   :  { %v339_v17 = vpop.xlane.xlu2 %338 }
 0x4aa   :  { %v342_v19 = vmul.f32 %v339_v17, %v667_v18 }
 0x4ac   :  { %v344_v20 = vadd.f32 1e-05, %v342_v19 }
 0x4ae   :  { %456 = vrsqrt.f32 %v344_v20  ;;  %vm352_vm15 = vweird.f32 %v344_v20 }
 0x4b1   :  { %v341_v21 = vpop.xlane.xlu1 %340 }
 0x4b2   :  { %v343_v22 = vmul.f32 %v341_v21, %v667_v18 }
 0x4b4   :  { %v457_v23 = vpop.eup %456  ;;  %v345_v24 = vadd.f32 1e-05, %v343_v22 }
 0x4b5   :  { %v347_v25 = vmul.f32 %v457_v23, %v344_v20  ;;  %vm353_vm14 = vweird.f32 %v457_v23 }
 0x4b6   :  { %458 = vrsqrt.f32 %v345_v24  ;;  %vm354_vm0 = vmor %vm352_vm15, %vm353_vm14  ;;  %vm362_vm2 = vweird.f32 %v345_v24 }
 0x4b7   :  { %v348_v26 = vmul.f32 %v457_v23, %v347_v25 }
 0x4b9   :  { %v349_v29 = vmul.f32 0.5, %v348_v26 }
 0x4bb   :  { %v350_v30 = vsub.f32 1.5, %v349_v29 }
 0x4bc   :  { %v459_v31 = vpop.eup %458 }
 0x4bd   :  { %v357_v32 = vmul.f32 %v459_v31, %v345_v24  ;;  %v351_v33 = vmul.f32 %v457_v23, %v350_v30  ;;  %vm363_vm1 = vweird.f32 %v459_v31 }
 0x4be   :  { %vm364_vm3 = vmor %vm362_vm2, %vm363_vm1 }
 0x4bf   :  { %v358_v34 = vmul.f32 %v459_v31, %v357_v32  ;;  %v355_v36 = vsel %vm354_vm0, %v457_v23, %v351_v33 }
 0x4c0   :  { %v366_v39 = vmul.f32 %v355_v36, %v334_v11 }
 0x4c1   :  { %v359_v35 = vmul.f32 0.5, %v358_v34 }
 0x4c2   :  { %v369_v44 = vmul.f32 %v444_v38, %v366_v39 }
 0x4c3   :  { %v360_v18 = vsub.f32 1.5, %v359_v35 }
 0x4c4   :  { %v372_v47 = vadd.f32 %v445_v43, %v369_v44 }
 0x4c5   :  { %v361_v37 = vmul.f32 %v459_v31, %v360_v18 }
 0x4c6   :  { %v374_v48 = vmax.f32 %v372_v47, 0.0 }
 0x4c7   :  { %v365_v40 = vsel %vm364_vm3, %v459_v31, %v361_v37 }
 0x4c8   :  { %v367_v41 = vmul.f32 %v365_v40, %v335_v15 }
 0x4ca   :  { %v370_v42 = vmul.f32 %v444_v38, %v367_v41 }
 0x4cc   :  { %v373_v45 = vadd.f32 %v445_v43, %v370_v42 }
 0x4ce   :  { %v375_v46 = vmax.f32 %v373_v45, 0.0 }
 0x4d0   :  { %397 = vmatpush.xpose.msra.mxu3 %v375_v46 }
 0x4d4   :  { %398 = vmatpush.xpose.msra.mxu3 %v374_v48 }
 0x4d7   :  { %399 = vmatmul.f32.vlgmr.msra.gmra.mxu3 %v376_v49 }
 0x55a   :  { %v400_v51 = vpop.f32.mrf.mxu3 }
 0x55b   :  { %v401_v52 = vadd.f32 %v400_v51, %v381_v50 }
 0x55d   :  { %404 = vst.msk [vmem:[#allocation11] sm:$0x1] %vm403_vm4, %v401_v52 }
 0x55e   :  { %415 = dma.vmem_to_hbm [thread:$0]  %s411_s4, 16, %s413_s19, [#allocation4]  }
 0x55f   :  { %610 = dma.done.wait [#allocation4], 16  }
 0x560   :  { %611 = vsyncadd [#allocation4], 4294967280 }
 0x561   :  { %420 = vsyncpa [#allocation3], 1 }
 0x562   :  { %421 = vsyncpa [#allocation6], 1 }
 0x563   :  { %422 = vsyncpa [#allocation9], 1 }
 0x564   :  { %423 = vsyncpa [#allocation4], 1 }

</bundles_post_ra>
